<compile_context>
chip_gen: v6e
topology: v6e:2x2x1
jax: 0.10.0
libtpu: 0.0.40
codegen_flags: <defaults>
</compile_context>

<pallas_src>
import numpy as np
import jax
import jax.numpy as jnp
from jax.experimental import pallas as pl
from jax.experimental.pallas import tpu as pltpu

BANDS = 8
H = W = 62
CONV_OUT = 60                      # 62 - 3 + 1
POOL_OUT = 12                      # 60 // 5
S36 = 3 * POOL_OUT                 # 36 pooled rows (co*12 + pi)
FC_IN = 3 * POOL_OUT * POOL_OUT    # 432
FC_HID = 128
FC_OUT = 3


# ---------------------------------------------------------------------------
# Host-side, one-time weight preparation (all linear algebra on tiny tensors)
# ---------------------------------------------------------------------------
def prepare_params(p):
    w_enc = p["w_enc"]                      # (bands, 3)
    b_enc = p["b_enc"].reshape(-1)          # (3,)
    w_conv = p["w_conv"]                    # (3, 3, 3, 3)  (co, ci, kh, kw)
    b_conv = p["b_conv"]                    # (3,)

    # Fold the (linear) encoder into the conv weights/bias -- exact.
    w_eff = jnp.einsum("ochw,bc->obhw", w_conv, w_enc)          # (3, bands, 3, 3)
    b_eff = b_conv + jnp.einsum("ochw,c->o", w_conv, b_enc)     # (3,)

    # AvgPool2d(5) weights with the conv kh/kw offsets folded in (0.2*0.2 = 1/25).
    pt = np.zeros((3, POOL_OUT, H), np.float32)    # (kh, pi, input row r)
    pq = np.zeros((3, W, POOL_OUT), np.float32)    # (kw, input col j, pj)
    for k in range(3):
        for r in range(H):
            v = r - k
            if 0 <= v < CONV_OUT:
                pt[k, v // 5, r] = 0.2
                pq[k, r, v // 5] = 0.2

    # Left operators L[kw] of shape (36, bands*62):
    #   L[kw][co*12+pi, band*62+r] = sum_kh w_eff[co,band,kh,kw] * pt[kh,pi,r]
    L = jnp.einsum("obhw,hpr->wopbr", w_eff, jnp.asarray(pt))   # (3,3,12,bands,62)
    L = L.reshape(3, S36, BANDS * H)

    b_pool = jnp.broadcast_to(b_eff[:, None, None], (3, POOL_OUT, POOL_OUT))
    b_pool = b_pool.reshape(S36, POOL_OUT)                      # (36, 12)

    return {
        "L": L,                                   # (3, 36, 496)
        "Pk": jnp.asarray(pq),                    # (3, 62, 12)
        "b_pool": b_pool,                         # (36, 12)
        "w1": p["w_fc1"].T,                       # (432, 128)
        "b1": p["b_fc1"].reshape(1, FC_HID),      # (1, 128)
        "w2": p["w_fc2"].T,                       # (128, 3)
        "b2": p["b_fc2"].reshape(1, FC_OUT),      # (1, 3)
    }


# ---------------------------------------------------------------------------
# Single fused kernel: (encoder-folded) conv + avgpool + relu + fc1 + relu + fc2
# One batch element per grid step; all weights resident in VMEM.
# ---------------------------------------------------------------------------
def _fused_kernel(x_ref, l_ref, p_ref, bp_ref, w1_ref, b1_ref, w2_ref, b2_ref,
                  o_ref, flat_ref):
    x = x_ref[0]                                   # (bands*62, 62) = (496, 62)

    # conv + avgpool as 3 pairs of MXU matmuls (one pair per kw tap column).
    acc = jnp.zeros((S36, POOL_OUT), jnp.float32)
    for kw in range(3):
        y = jnp.dot(l_ref[kw], x, preferred_element_type=jnp.float32)        # (36, 62)
        acc = acc + jnp.dot(y, p_ref[kw], preferred_element_type=jnp.float32)  # (36, 12)

    act = jnp.maximum(acc + bp_ref[...], 0.0)      # (36, 12), row = co*12+pi, col = pj

    # Flatten to PyTorch order (co, pi, pj) into a lane-dense (1, 432) VMEM row.
    # Static row-wise copies: guaranteed to lower, tiny absolute cost.
    for s in range(S36):
        flat_ref[:, s * POOL_OUT:(s + 1) * POOL_OUT] = act[s:s + 1, :]

    h = jnp.dot(flat_ref[...], w1_ref[...],
                preferred_element_type=jnp.float32) + b1_ref[...]             # (1, 128)
    h = jnp.maximum(h, 0.0)
    o_ref[0] = jnp.dot(h, w2_ref[...],
                       preferred_element_type=jnp.float32) + b2_ref[...]      # (1, 3)


def classifier_forward(x, kp):
    b = x.shape[0]
    xr = x.reshape(b, BANDS * H, W)                # free reshape (merges contiguous dims)
    out = pl.pallas_call(
        _fused_kernel,
        out_shape=jax.ShapeDtypeStruct((b, 1, FC_OUT), jnp.float32),
        grid=(b,),
        in_specs=[
            pl.BlockSpec((1, BANDS * H, W), lambda i: (i, 0, 0)),     # input image
            pl.BlockSpec((3, S36, BANDS * H), lambda i: (0, 0, 0)),   # L (resident)
            pl.BlockSpec((3, W, POOL_OUT), lambda i: (0, 0, 0)),      # Pk (resident)
            pl.BlockSpec((S36, POOL_OUT), lambda i: (0, 0)),          # pooled bias
            pl.BlockSpec((FC_IN, FC_HID), lambda i: (0, 0)),          # w1 (resident)
            pl.BlockSpec((1, FC_HID), lambda i: (0, 0)),              # b1
            pl.BlockSpec((FC_HID, FC_OUT), lambda i: (0, 0)),         # w2
            pl.BlockSpec((1, FC_OUT), lambda i: (0, 0)),              # b2
        ],
        out_specs=pl.BlockSpec((1, 1, FC_OUT), lambda i: (i, 0, 0)),
        scratch_shapes=[pltpu.VMEM((1, FC_IN), jnp.float32)],
        compiler_params=pltpu.CompilerParams(dimension_semantics=("parallel",)),
    )(xr, kp["L"], kp["Pk"], kp["b_pool"], kp["w1"], kp["b1"], kp["w2"], kp["b2"])
    return out.reshape(b, FC_OUT)


# ---------------------------------------------------------------------------
# Pure-JAX reference (mirrors the PyTorch forward; for correctness check only)
# ---------------------------------------------------------------------------
def reference_forward(x, p):
    batch, ch, w, h = x.shape
    pix = jnp.transpose(x, (0, 2, 3, 1)).reshape(-1, ch)
    enc = pix @ p["w_enc"] + p["b_enc"]
    enc = jnp.transpose(enc.reshape(batch, w, h, 3), (0, 3, 1, 2))
    conv = jax.lax.conv_general_dilated(
        enc, p["w_conv"], (1, 1), "VALID",
        dimension_numbers=("NCHW", "OIHW", "NCHW")) + p["b_conv"][None, :, None, None]
    pooled = jax.lax.reduce_window(conv, 0.0, jax.lax.add,
                                   (1, 1, 5, 5), (1, 1, 5, 5), "VALID") / 25.0
    act = jnp.maximum(pooled, 0.0)
    flat = act.reshape(batch, -1)
    hid = jnp.maximum(flat @ p["w_fc1"].T + p["b_fc1"], 0.0)
    return hid @ p["w_fc2"].T + p["b_fc2"]


def make_params(key):
    k_enc, k_benc, k_conv, k_fc1, k_fc2 = jax.random.split(key, 5)
    return {
        # synthetic autoencoder encoder: Linear(bands, 3)
        "w_enc": jax.random.normal(k_enc, (BANDS, 3), jnp.float32) * 0.1,
        "b_enc": jax.random.normal(k_benc, (1, 3), jnp.float32) * 0.05,
        # Conv2d(3,3,3): kaiming_normal_ fan_in (std = sqrt(2/27)), bias 0
        "w_conv": jax.random.normal(k_conv, (3, 3, 3, 3), jnp.float32)
                  * float(np.sqrt(2.0 / 27.0)),
        "b_conv": jnp.zeros((3,), jnp.float32),
        # Linear layers: normal std=0.001, bias 0 (PyTorch (out, in) layout)
        "w_fc1": jax.random.normal(k_fc1, (FC_HID, FC_IN), jnp.float32) * 0.001,
        "b_fc1": jnp.zeros((FC_HID,), jnp.float32),
        "w_fc2": jax.random.normal(k_fc2, (FC_OUT, FC_HID), jnp.float32) * 0.001,
        "b_fc2": jnp.zeros((FC_OUT,), jnp.float32),
    }


if __name__ == "__main__":
    key = jax.random.PRNGKey(0)
    k_x, k_p = jax.random.split(key)
    x = jax.random.normal(k_x, (2, BANDS, H, W), jnp.float32)
    params = make_params(k_p)
    kparams = prepare_params(params)          # one-time fold / transpose of weights

    fwd = jax.jit(classifier_forward)
    out = jax.block_until_ready(fwd(x, kparams))

    assert out.shape == (2, FC_OUT), out.shape
    assert bool(jnp.all(jnp.isfinite(out)))

    ref = jax.block_until_ready(reference_forward(x, params))
    np.testing.assert_allclose(np.asarray(out), np.asarray(ref),
                               rtol=2e-2, atol=2e-6)

    print("KERNEL_OK")
</pallas_src>

<mosaic_0001>
module attributes {stable_mosaic.version = 11 : i64} {
  func.func @_fused_kernel(%arg0: i32, %arg1: memref<1x496x62xf32, #tpu.memory_space<vmem>>, %arg2: memref<3x36x496xf32, #tpu.memory_space<vmem>>, %arg3: memref<3x62x12xf32, #tpu.memory_space<vmem>>, %arg4: memref<36x12xf32, #tpu.memory_space<vmem>>, %arg5: memref<432x128xf32, #tpu.memory_space<vmem>>, %arg6: memref<1x128xf32, #tpu.memory_space<vmem>>, %arg7: memref<128x3xf32, #tpu.memory_space<vmem>>, %arg8: memref<1x3xf32, #tpu.memory_space<vmem>>, %arg9: memref<1x1x3xf32, #tpu.memory_space<vmem>>, %arg10: memref<1x432xf32, #tpu.memory_space<vmem>>) attributes {dimension_semantics = [#tpu.dimension_semantics<parallel>], iteration_bounds = array<i64: 2>, scalar_prefetch = 0 : i64, scratch_operands = 1 : i64, tpu.core_type = #tpu.core_type<tc>, window_params = [{transform_indices = @transform_0, window_bounds = array<i64: 1, 496, 62>}, {pipeline_mode = #tpu.pipeline_mode<synchronous>, transform_indices = @transform_1, window_bounds = array<i64: 3, 36, 496>}, {pipeline_mode = #tpu.pipeline_mode<synchronous>, transform_indices = @transform_2, window_bounds = array<i64: 3, 62, 12>}, {pipeline_mode = #tpu.pipeline_mode<synchronous>, transform_indices = @transform_3, window_bounds = array<i64: 36, 12>}, {pipeline_mode = #tpu.pipeline_mode<synchronous>, transform_indices = @transform_4, window_bounds = array<i64: 432, 128>}, {pipeline_mode = #tpu.pipeline_mode<synchronous>, transform_indices = @transform_5, window_bounds = array<i64: 1, 128>}, {pipeline_mode = #tpu.pipeline_mode<synchronous>, transform_indices = @transform_6, window_bounds = array<i64: 128, 3>}, {pipeline_mode = #tpu.pipeline_mode<synchronous>, transform_indices = @transform_7, window_bounds = array<i64: 1, 3>}, {transform_indices = @transform_8, window_bounds = array<i64: 1, 1, 3>}]} {
    %c0 = arith.constant 0 : index
    %c0_0 = arith.constant 0 : index
    %c0_1 = arith.constant 0 : index
    %0 = vector.load %arg1[%c0, %c0_0, %c0_1] : memref<1x496x62xf32, #tpu.memory_space<vmem>>, vector<1x496x62xf32>
    %1 = vector.shape_cast %0 : vector<1x496x62xf32> to vector<496x62xf32>
    %cst = arith.constant 0.000000e+00 : f32
    %2 = vector.broadcast %cst : f32 to vector<36x12xf32>
    %c0_2 = arith.constant 0 : index
    %c0_3 = arith.constant 0 : index
    %c0_4 = arith.constant 0 : index
    %3 = vector.load %arg2[%c0_2, %c0_3, %c0_4] : memref<3x36x496xf32, #tpu.memory_space<vmem>>, vector<1x36x496xf32>
    %4 = vector.shape_cast %3 : vector<1x36x496xf32> to vector<36x496xf32>
    %cst_5 = arith.constant dense<0.000000e+00> : vector<36x62xf32>
    %5 = tpu.matmul %4, %1, %cst_5 {dimension_numbers = #tpu.dot_dimension_numbers<[1], [0], [0], [1], [0, 0, 1, 1], [], []>} : vector<36x496xf32>, vector<496x62xf32>, vector<36x62xf32> -> vector<36x62xf32>
    %c0_6 = arith.constant 0 : index
    %c0_7 = arith.constant 0 : index
    %c0_8 = arith.constant 0 : index
    %6 = vector.load %arg3[%c0_6, %c0_7, %c0_8] : memref<3x62x12xf32, #tpu.memory_space<vmem>>, vector<1x62x12xf32>
    %7 = vector.shape_cast %6 : vector<1x62x12xf32> to vector<62x12xf32>
    %cst_9 = arith.constant dense<0.000000e+00> : vector<36x12xf32>
    %8 = tpu.matmul %5, %7, %cst_9 {dimension_numbers = #tpu.dot_dimension_numbers<[1], [0], [0], [1], [0, 0, 1, 1], [], []>} : vector<36x62xf32>, vector<62x12xf32>, vector<36x12xf32> -> vector<36x12xf32>
    %9 = arith.addf %2, %8 : vector<36x12xf32>
    %c1 = arith.constant 1 : index
    %c0_10 = arith.constant 0 : index
    %c0_11 = arith.constant 0 : index
    %10 = vector.load %arg2[%c1, %c0_10, %c0_11] : memref<3x36x496xf32, #tpu.memory_space<vmem>>, vector<1x36x496xf32>
    %11 = vector.shape_cast %10 : vector<1x36x496xf32> to vector<36x496xf32>
    %cst_12 = arith.constant dense<0.000000e+00> : vector<36x62xf32>
    %12 = tpu.matmul %11, %1, %cst_12 {dimension_numbers = #tpu.dot_dimension_numbers<[1], [0], [0], [1], [0, 0, 1, 1], [], []>} : vector<36x496xf32>, vector<496x62xf32>, vector<36x62xf32> -> vector<36x62xf32>
    %c1_13 = arith.constant 1 : index
    %c0_14 = arith.constant 0 : index
    %c0_15 = arith.constant 0 : index
    %13 = vector.load %arg3[%c1_13, %c0_14, %c0_15] : memref<3x62x12xf32, #tpu.memory_space<vmem>>, vector<1x62x12xf32>
    %14 = vector.shape_cast %13 : vector<1x62x12xf32> to vector<62x12xf32>
    %cst_16 = arith.constant dense<0.000000e+00> : vector<36x12xf32>
    %15 = tpu.matmul %12, %14, %cst_16 {dimension_numbers = #tpu.dot_dimension_numbers<[1], [0], [0], [1], [0, 0, 1, 1], [], []>} : vector<36x62xf32>, vector<62x12xf32>, vector<36x12xf32> -> vector<36x12xf32>
    %16 = arith.addf %9, %15 : vector<36x12xf32>
    %c2 = arith.constant 2 : index
    %c0_17 = arith.constant 0 : index
    %c0_18 = arith.constant 0 : index
    %17 = vector.load %arg2[%c2, %c0_17, %c0_18] : memref<3x36x496xf32, #tpu.memory_space<vmem>>, vector<1x36x496xf32>
    %18 = vector.shape_cast %17 : vector<1x36x496xf32> to vector<36x496xf32>
    %cst_19 = arith.constant dense<0.000000e+00> : vector<36x62xf32>
    %19 = tpu.matmul %18, %1, %cst_19 {dimension_numbers = #tpu.dot_dimension_numbers<[1], [0], [0], [1], [0, 0, 1, 1], [], []>} : vector<36x496xf32>, vector<496x62xf32>, vector<36x62xf32> -> vector<36x62xf32>
    %c2_20 = arith.constant 2 : index
    %c0_21 = arith.constant 0 : index
    %c0_22 = arith.constant 0 : index
    %20 = vector.load %arg3[%c2_20, %c0_21, %c0_22] : memref<3x62x12xf32, #tpu.memory_space<vmem>>, vector<1x62x12xf32>
    %21 = vector.shape_cast %20 : vector<1x62x12xf32> to vector<62x12xf32>
    %cst_23 = arith.constant dense<0.000000e+00> : vector<36x12xf32>
    %22 = tpu.matmul %19, %21, %cst_23 {dimension_numbers = #tpu.dot_dimension_numbers<[1], [0], [0], [1], [0, 0, 1, 1], [], []>} : vector<36x62xf32>, vector<62x12xf32>, vector<36x12xf32> -> vector<36x12xf32>
    %23 = arith.addf %16, %22 : vector<36x12xf32>
    %c0_24 = arith.constant 0 : index
    %c0_25 = arith.constant 0 : index
    %24 = vector.load %arg4[%c0_24, %c0_25] : memref<36x12xf32, #tpu.memory_space<vmem>>, vector<36x12xf32>
    %25 = arith.addf %23, %24 : vector<36x12xf32>
    %cst_26 = arith.constant 0.000000e+00 : f32
    %26 = vector.broadcast %cst_26 : f32 to vector<36x12xf32>
    %27 = arith.maximumf %25, %26 : vector<36x12xf32>
    %28 = vector.extract_strided_slice %27 {offsets = [0, 0], sizes = [1, 12], strides = [1, 1]} : vector<36x12xf32> to vector<1x12xf32>
    %c0_27 = arith.constant 0 : index
    %c0_28 = arith.constant 0 : index
    %29 = vector.load %arg10[%c0_27, %c0_28] : memref<1x432xf32, #tpu.memory_space<vmem>>, vector<1x12xf32>
    tpu.vector_store %arg10[%c0_27, %c0_28], %28 {strides = array<i32>} : memref<1x432xf32, #tpu.memory_space<vmem>>, vector<1x12xf32>,
    %30 = vector.extract_strided_slice %27 {offsets = [1, 0], sizes = [1, 12], strides = [1, 1]} : vector<36x12xf32> to vector<1x12xf32>
    %c0_29 = arith.constant 0 : index
    %c12 = arith.constant 12 : index
    %31 = vector.load %arg10[%c0_29, %c12] : memref<1x432xf32, #tpu.memory_space<vmem>>, vector<1x12xf32>
    tpu.vector_store %arg10[%c0_29, %c12], %30 {strides = array<i32>} : memref<1x432xf32, #tpu.memory_space<vmem>>, vector<1x12xf32>,
    %32 = vector.extract_strided_slice %27 {offsets = [2, 0], sizes = [1, 12], strides = [1, 1]} : vector<36x12xf32> to vector<1x12xf32>
    %c0_30 = arith.constant 0 : index
    %c24 = arith.constant 24 : index
    %33 = vector.load %arg10[%c0_30, %c24] : memref<1x432xf32, #tpu.memory_space<vmem>>, vector<1x12xf32>
    tpu.vector_store %arg10[%c0_30, %c24], %32 {strides = array<i32>} : memref<1x432xf32, #tpu.memory_space<vmem>>, vector<1x12xf32>,
    %34 = vector.extract_strided_slice %27 {offsets = [3, 0], sizes = [1, 12], strides = [1, 1]} : vector<36x12xf32> to vector<1x12xf32>
    %c0_31 = arith.constant 0 : index
    %c36 = arith.constant 36 : index
    %35 = vector.load %arg10[%c0_31, %c36] : memref<1x432xf32, #tpu.memory_space<vmem>>, vector<1x12xf32>
    tpu.vector_store %arg10[%c0_31, %c36], %34 {strides = array<i32>} : memref<1x432xf32, #tpu.memory_space<vmem>>, vector<1x12xf32>,
    %36 = vector.extract_strided_slice %27 {offsets = [4, 0], sizes = [1, 12], strides = [1, 1]} : vector<36x12xf32> to vector<1x12xf32>
    %c0_32 = arith.constant 0 : index
    %c48 = arith.constant 48 : index
    %37 = vector.load %arg10[%c0_32, %c48] : memref<1x432xf32, #tpu.memory_space<vmem>>, vector<1x12xf32>
    tpu.vector_store %arg10[%c0_32, %c48], %36 {strides = array<i32>} : memref<1x432xf32, #tpu.memory_space<vmem>>, vector<1x12xf32>,
    %38 = vector.extract_strided_slice %27 {offsets = [5, 0], sizes = [1, 12], strides = [1, 1]} : vector<36x12xf32> to vector<1x12xf32>
    %c0_33 = arith.constant 0 : index
    %c60 = arith.constant 60 : index
    %39 = vector.load %arg10[%c0_33, %c60] : memref<1x432xf32, #tpu.memory_space<vmem>>, vector<1x12xf32>
    tpu.vector_store %arg10[%c0_33, %c60], %38 {strides = array<i32>} : memref<1x432xf32, #tpu.memory_space<vmem>>, vector<1x12xf32>,
    %40 = vector.extract_strided_slice %27 {offsets = [6, 0], sizes = [1, 12], strides = [1, 1]} : vector<36x12xf32> to vector<1x12xf32>
    %c0_34 = arith.constant 0 : index
    %c72 = arith.constant 72 : index
    %41 = vector.load %arg10[%c0_34, %c72] : memref<1x432xf32, #tpu.memory_space<vmem>>, vector<1x12xf32>
    tpu.vector_store %arg10[%c0_34, %c72], %40 {strides = array<i32>} : memref<1x432xf32, #tpu.memory_space<vmem>>, vector<1x12xf32>,
    %42 = vector.extract_strided_slice %27 {offsets = [7, 0], sizes = [1, 12], strides = [1, 1]} : vector<36x12xf32> to vector<1x12xf32>
    %c0_35 = arith.constant 0 : index
    %c84 = arith.constant 84 : index
    %43 = vector.load %arg10[%c0_35, %c84] : memref<1x432xf32, #tpu.memory_space<vmem>>, vector<1x12xf32>
    tpu.vector_store %arg10[%c0_35, %c84], %42 {strides = array<i32>} : memref<1x432xf32, #tpu.memory_space<vmem>>, vector<1x12xf32>,
    %44 = vector.extract_strided_slice %27 {offsets = [8, 0], sizes = [1, 12], strides = [1, 1]} : vector<36x12xf32> to vector<1x12xf32>
    %c0_36 = arith.constant 0 : index
    %c96 = arith.constant 96 : index
    %45 = vector.load %arg10[%c0_36, %c96] : memref<1x432xf32, #tpu.memory_space<vmem>>, vector<1x12xf32>
    tpu.vector_store %arg10[%c0_36, %c96], %44 {strides = array<i32>} : memref<1x432xf32, #tpu.memory_space<vmem>>, vector<1x12xf32>,
    %46 = vector.extract_strided_slice %27 {offsets = [9, 0], sizes = [1, 12], strides = [1, 1]} : vector<36x12xf32> to vector<1x12xf32>
    %c0_37 = arith.constant 0 : index
    %c108 = arith.constant 108 : index
    %47 = vector.load %arg10[%c0_37, %c108] : memref<1x432xf32, #tpu.memory_space<vmem>>, vector<1x12xf32>
    tpu.vector_store %arg10[%c0_37, %c108], %46 {strides = array<i32>} : memref<1x432xf32, #tpu.memory_space<vmem>>, vector<1x12xf32>,
    %48 = vector.extract_strided_slice %27 {offsets = [10, 0], sizes = [1, 12], strides = [1, 1]} : vector<36x12xf32> to vector<1x12xf32>
    %c0_38 = arith.constant 0 : index
    %c120 = arith.constant 120 : index
    %49 = vector.load %arg10[%c0_38, %c120] : memref<1x432xf32, #tpu.memory_space<vmem>>, vector<1x12xf32>
    tpu.vector_store %arg10[%c0_38, %c120], %48 {strides = array<i32>} : memref<1x432xf32, #tpu.memory_space<vmem>>, vector<1x12xf32>,
    %50 = vector.extract_strided_slice %27 {offsets = [11, 0], sizes = [1, 12], strides = [1, 1]} : vector<36x12xf32> to vector<1x12xf32>
    %c0_39 = arith.constant 0 : index
    %c132 = arith.constant 132 : index
    %51 = vector.load %arg10[%c0_39, %c132] : memref<1x432xf32, #tpu.memory_space<vmem>>, vector<1x12xf32>
    tpu.vector_store %arg10[%c0_39, %c132], %50 {strides = array<i32>} : memref<1x432xf32, #tpu.memory_space<vmem>>, vector<1x12xf32>,
    %52 = vector.extract_strided_slice %27 {offsets = [12, 0], sizes = [1, 12], strides = [1, 1]} : vector<36x12xf32> to vector<1x12xf32>
    %c0_40 = arith.constant 0 : index
    %c144 = arith.constant 144 : index
    %53 = vector.load %arg10[%c0_40, %c144] : memref<1x432xf32, #tpu.memory_space<vmem>>, vector<1x12xf32>
    tpu.vector_store %arg10[%c0_40, %c144], %52 {strides = array<i32>} : memref<1x432xf32, #tpu.memory_space<vmem>>, vector<1x12xf32>,
    %54 = vector.extract_strided_slice %27 {offsets = [13, 0], sizes = [1, 12], strides = [1, 1]} : vector<36x12xf32> to vector<1x12xf32>
    %c0_41 = arith.constant 0 : index
    %c156 = arith.constant 156 : index
    %55 = vector.load %arg10[%c0_41, %c156] : memref<1x432xf32, #tpu.memory_space<vmem>>, vector<1x12xf32>
    tpu.vector_store %arg10[%c0_41, %c156], %54 {strides = array<i32>} : memref<1x432xf32, #tpu.memory_space<vmem>>, vector<1x12xf32>,
    %56 = vector.extract_strided_slice %27 {offsets = [14, 0], sizes = [1, 12], strides = [1, 1]} : vector<36x12xf32> to vector<1x12xf32>
    %c0_42 = arith.constant 0 : index
    %c168 = arith.constant 168 : index
    %57 = vector.load %arg10[%c0_42, %c168] : memref<1x432xf32, #tpu.memory_space<vmem>>, vector<1x12xf32>
    tpu.vector_store %arg10[%c0_42, %c168], %56 {strides = array<i32>} : memref<1x432xf32, #tpu.memory_space<vmem>>, vector<1x12xf32>,
    %58 = vector.extract_strided_slice %27 {offsets = [15, 0], sizes = [1, 12], strides = [1, 1]} : vector<36x12xf32> to vector<1x12xf32>
    %c0_43 = arith.constant 0 : index
    %c180 = arith.constant 180 : index
    %59 = vector.load %arg10[%c0_43, %c180] : memref<1x432xf32, #tpu.memory_space<vmem>>, vector<1x12xf32>
    tpu.vector_store %arg10[%c0_43, %c180], %58 {strides = array<i32>} : memref<1x432xf32, #tpu.memory_space<vmem>>, vector<1x12xf32>,
    %60 = vector.extract_strided_slice %27 {offsets = [16, 0], sizes = [1, 12], strides = [1, 1]} : vector<36x12xf32> to vector<1x12xf32>
    %c0_44 = arith.constant 0 : index
    %c192 = arith.constant 192 : index
    %61 = vector.load %arg10[%c0_44, %c192] : memref<1x432xf32, #tpu.memory_space<vmem>>, vector<1x12xf32>
    tpu.vector_store %arg10[%c0_44, %c192], %60 {strides = array<i32>} : memref<1x432xf32, #tpu.memory_space<vmem>>, vector<1x12xf32>,
    %62 = vector.extract_strided_slice %27 {offsets = [17, 0], sizes = [1, 12], strides = [1, 1]} : vector<36x12xf32> to vector<1x12xf32>
    %c0_45 = arith.constant 0 : index
    %c204 = arith.constant 204 : index
    %63 = vector.load %arg10[%c0_45, %c204] : memref<1x432xf32, #tpu.memory_space<vmem>>, vector<1x12xf32>
    tpu.vector_store %arg10[%c0_45, %c204], %62 {strides = array<i32>} : memref<1x432xf32, #tpu.memory_space<vmem>>, vector<1x12xf32>,
    %64 = vector.extract_strided_slice %27 {offsets = [18, 0], sizes = [1, 12], strides = [1, 1]} : vector<36x12xf32> to vector<1x12xf32>
    %c0_46 = arith.constant 0 : index
    %c216 = arith.constant 216 : index
    %65 = vector.load %arg10[%c0_46, %c216] : memref<1x432xf32, #tpu.memory_space<vmem>>, vector<1x12xf32>
    tpu.vector_store %arg10[%c0_46, %c216], %64 {strides = array<i32>} : memref<1x432xf32, #tpu.memory_space<vmem>>, vector<1x12xf32>,
    %66 = vector.extract_strided_slice %27 {offsets = [19, 0], sizes = [1, 12], strides = [1, 1]} : vector<36x12xf32> to vector<1x12xf32>
    %c0_47 = arith.constant 0 : index
    %c228 = arith.constant 228 : index
    %67 = vector.load %arg10[%c0_47, %c228] : memref<1x432xf32, #tpu.memory_space<vmem>>, vector<1x12xf32>
    tpu.vector_store %arg10[%c0_47, %c228], %66 {strides = array<i32>} : memref<1x432xf32, #tpu.memory_space<vmem>>, vector<1x12xf32>,
    %68 = vector.extract_strided_slice %27 {offsets = [20, 0], sizes = [1, 12], strides = [1, 1]} : vector<36x12xf32> to vector<1x12xf32>
    %c0_48 = arith.constant 0 : index
    %c240 = arith.constant 240 : index
    %69 = vector.load %arg10[%c0_48, %c240] : memref<1x432xf32, #tpu.memory_space<vmem>>, vector<1x12xf32>
    tpu.vector_store %arg10[%c0_48, %c240], %68 {strides = array<i32>} : memref<1x432xf32, #tpu.memory_space<vmem>>, vector<1x12xf32>,
    %70 = vector.extract_strided_slice %27 {offsets = [21, 0], sizes = [1, 12], strides = [1, 1]} : vector<36x12xf32> to vector<1x12xf32>
    %c0_49 = arith.constant 0 : index
    %c252 = arith.constant 252 : index
    %71 = vector.load %arg10[%c0_49, %c252] : memref<1x432xf32, #tpu.memory_space<vmem>>, vector<1x12xf32>
    tpu.vector_store %arg10[%c0_49, %c252], %70 {strides = array<i32>} : memref<1x432xf32, #tpu.memory_space<vmem>>, vector<1x12xf32>,
    %72 = vector.extract_strided_slice %27 {offsets = [22, 0], sizes = [1, 12], strides = [1, 1]} : vector<36x12xf32> to vector<1x12xf32>
    %c0_50 = arith.constant 0 : index
    %c264 = arith.constant 264 : index
    %73 = vector.load %arg10[%c0_50, %c264] : memref<1x432xf32, #tpu.memory_space<vmem>>, vector<1x12xf32>
    tpu.vector_store %arg10[%c0_50, %c264], %72 {strides = array<i32>} : memref<1x432xf32, #tpu.memory_space<vmem>>, vector<1x12xf32>,
    %74 = vector.extract_strided_slice %27 {offsets = [23, 0], sizes = [1, 12], strides = [1, 1]} : vector<36x12xf32> to vector<1x12xf32>
    %c0_51 = arith.constant 0 : index
    %c276 = arith.constant 276 : index
    %75 = vector.load %arg10[%c0_51, %c276] : memref<1x432xf32, #tpu.memory_space<vmem>>, vector<1x12xf32>
    tpu.vector_store %arg10[%c0_51, %c276], %74 {strides = array<i32>} : memref<1x432xf32, #tpu.memory_space<vmem>>, vector<1x12xf32>,
    %76 = vector.extract_strided_slice %27 {offsets = [24, 0], sizes = [1, 12], strides = [1, 1]} : vector<36x12xf32> to vector<1x12xf32>
    %c0_52 = arith.constant 0 : index
    %c288 = arith.constant 288 : index
    %77 = vector.load %arg10[%c0_52, %c288] : memref<1x432xf32, #tpu.memory_space<vmem>>, vector<1x12xf32>
    tpu.vector_store %arg10[%c0_52, %c288], %76 {strides = array<i32>} : memref<1x432xf32, #tpu.memory_space<vmem>>, vector<1x12xf32>,
    %78 = vector.extract_strided_slice %27 {offsets = [25, 0], sizes = [1, 12], strides = [1, 1]} : vector<36x12xf32> to vector<1x12xf32>
    %c0_53 = arith.constant 0 : index
    %c300 = arith.constant 300 : index
    %79 = vector.load %arg10[%c0_53, %c300] : memref<1x432xf32, #tpu.memory_space<vmem>>, vector<1x12xf32>
    tpu.vector_store %arg10[%c0_53, %c300], %78 {strides = array<i32>} : memref<1x432xf32, #tpu.memory_space<vmem>>, vector<1x12xf32>,
    %80 = vector.extract_strided_slice %27 {offsets = [26, 0], sizes = [1, 12], strides = [1, 1]} : vector<36x12xf32> to vector<1x12xf32>
    %c0_54 = arith.constant 0 : index
    %c312 = arith.constant 312 : index
    %81 = vector.load %arg10[%c0_54, %c312] : memref<1x432xf32, #tpu.memory_space<vmem>>, vector<1x12xf32>
    tpu.vector_store %arg10[%c0_54, %c312], %80 {strides = array<i32>} : memref<1x432xf32, #tpu.memory_space<vmem>>, vector<1x12xf32>,
    %82 = vector.extract_strided_slice %27 {offsets = [27, 0], sizes = [1, 12], strides = [1, 1]} : vector<36x12xf32> to vector<1x12xf32>
    %c0_55 = arith.constant 0 : index
    %c324 = arith.constant 324 : index
    %83 = vector.load %arg10[%c0_55, %c324] : memref<1x432xf32, #tpu.memory_space<vmem>>, vector<1x12xf32>
    tpu.vector_store %arg10[%c0_55, %c324], %82 {strides = array<i32>} : memref<1x432xf32, #tpu.memory_space<vmem>>, vector<1x12xf32>,
    %84 = vector.extract_strided_slice %27 {offsets = [28, 0], sizes = [1, 12], strides = [1, 1]} : vector<36x12xf32> to vector<1x12xf32>
    %c0_56 = arith.constant 0 : index
    %c336 = arith.constant 336 : index
    %85 = vector.load %arg10[%c0_56, %c336] : memref<1x432xf32, #tpu.memory_space<vmem>>, vector<1x12xf32>
    tpu.vector_store %arg10[%c0_56, %c336], %84 {strides = array<i32>} : memref<1x432xf32, #tpu.memory_space<vmem>>, vector<1x12xf32>,
    %86 = vector.extract_strided_slice %27 {offsets = [29, 0], sizes = [1, 12], strides = [1, 1]} : vector<36x12xf32> to vector<1x12xf32>
    %c0_57 = arith.constant 0 : index
    %c348 = arith.constant 348 : index
    %87 = vector.load %arg10[%c0_57, %c348] : memref<1x432xf32, #tpu.memory_space<vmem>>, vector<1x12xf32>
    tpu.vector_store %arg10[%c0_57, %c348], %86 {strides = array<i32>} : memref<1x432xf32, #tpu.memory_space<vmem>>, vector<1x12xf32>,
    %88 = vector.extract_strided_slice %27 {offsets = [30, 0], sizes = [1, 12], strides = [1, 1]} : vector<36x12xf32> to vector<1x12xf32>
    %c0_58 = arith.constant 0 : index
    %c360 = arith.constant 360 : index
    %89 = vector.load %arg10[%c0_58, %c360] : memref<1x432xf32, #tpu.memory_space<vmem>>, vector<1x12xf32>
    tpu.vector_store %arg10[%c0_58, %c360], %88 {strides = array<i32>} : memref<1x432xf32, #tpu.memory_space<vmem>>, vector<1x12xf32>,
    %90 = vector.extract_strided_slice %27 {offsets = [31, 0], sizes = [1, 12], strides = [1, 1]} : vector<36x12xf32> to vector<1x12xf32>
    %c0_59 = arith.constant 0 : index
    %c372 = arith.constant 372 : index
    %91 = vector.load %arg10[%c0_59, %c372] : memref<1x432xf32, #tpu.memory_space<vmem>>, vector<1x12xf32>
    tpu.vector_store %arg10[%c0_59, %c372], %90 {strides = array<i32>} : memref<1x432xf32, #tpu.memory_space<vmem>>, vector<1x12xf32>,
    %92 = vector.extract_strided_slice %27 {offsets = [32, 0], sizes = [1, 12], strides = [1, 1]} : vector<36x12xf32> to vector<1x12xf32>
    %c0_60 = arith.constant 0 : index
    %c384 = arith.constant 384 : index
    %93 = vector.load %arg10[%c0_60, %c384] : memref<1x432xf32, #tpu.memory_space<vmem>>, vector<1x12xf32>
    tpu.vector_store %arg10[%c0_60, %c384], %92 {strides = array<i32>} : memref<1x432xf32, #tpu.memory_space<vmem>>, vector<1x12xf32>,
    %94 = vector.extract_strided_slice %27 {offsets = [33, 0], sizes = [1, 12], strides = [1, 1]} : vector<36x12xf32> to vector<1x12xf32>
    %c0_61 = arith.constant 0 : index
    %c396 = arith.constant 396 : index
    %95 = vector.load %arg10[%c0_61, %c396] : memref<1x432xf32, #tpu.memory_space<vmem>>, vector<1x12xf32>
    tpu.vector_store %arg10[%c0_61, %c396], %94 {strides = array<i32>} : memref<1x432xf32, #tpu.memory_space<vmem>>, vector<1x12xf32>,
    %96 = vector.extract_strided_slice %27 {offsets = [34, 0], sizes = [1, 12], strides = [1, 1]} : vector<36x12xf32> to vector<1x12xf32>
    %c0_62 = arith.constant 0 : index
    %c408 = arith.constant 408 : index
    %97 = vector.load %arg10[%c0_62, %c408] : memref<1x432xf32, #tpu.memory_space<vmem>>, vector<1x12xf32>
    tpu.vector_store %arg10[%c0_62, %c408], %96 {strides = array<i32>} : memref<1x432xf32, #tpu.memory_space<vmem>>, vector<1x12xf32>,
    %98 = vector.extract_strided_slice %27 {offsets = [35, 0], sizes = [1, 12], strides = [1, 1]} : vector<36x12xf32> to vector<1x12xf32>
    %c0_63 = arith.constant 0 : index
    %c420 = arith.constant 420 : index
    %99 = vector.load %arg10[%c0_63, %c420] : memref<1x432xf32, #tpu.memory_space<vmem>>, vector<1x12xf32>
    tpu.vector_store %arg10[%c0_63, %c420], %98 {strides = array<i32>} : memref<1x432xf32, #tpu.memory_space<vmem>>, vector<1x12xf32>,
    %c0_64 = arith.constant 0 : index
    %c0_65 = arith.constant 0 : index
    %100 = vector.load %arg10[%c0_64, %c0_65] : memref<1x432xf32, #tpu.memory_space<vmem>>, vector<1x432xf32>
    %c0_66 = arith.constant 0 : index
    %c0_67 = arith.constant 0 : index
    %101 = vector.load %arg5[%c0_66, %c0_67] : memref<432x128xf32, #tpu.memory_space<vmem>>, vector<432x128xf32>
    %cst_68 = arith.constant dense<0.000000e+00> : vector<1x128xf32>
    %102 = tpu.matmul %100, %101, %cst_68 {dimension_numbers = #tpu.dot_dimension_numbers<[1], [0], [0], [1], [0, 0, 1, 1], [], []>} : vector<1x432xf32>, vector<432x128xf32>, vector<1x128xf32> -> vector<1x128xf32>
    %c0_69 = arith.constant 0 : index
    %c0_70 = arith.constant 0 : index
    %103 = vector.load %arg6[%c0_69, %c0_70] : memref<1x128xf32, #tpu.memory_space<vmem>>, vector<1x128xf32>
    %104 = arith.addf %102, %103 : vector<1x128xf32>
    %cst_71 = arith.constant 0.000000e+00 : f32
    %105 = vector.broadcast %cst_71 : f32 to vector<1x128xf32>
    %106 = arith.maximumf %104, %105 : vector<1x128xf32>
    %c0_72 = arith.constant 0 : index
    %c0_73 = arith.constant 0 : index
    %107 = vector.load %arg7[%c0_72, %c0_73] : memref<128x3xf32, #tpu.memory_space<vmem>>, vector<128x3xf32>
    %cst_74 = arith.constant dense<0.000000e+00> : vector<1x3xf32>
    %108 = tpu.matmul %106, %107, %cst_74 {dimension_numbers = #tpu.dot_dimension_numbers<[1], [0], [0], [1], [0, 0, 1, 1], [], []>} : vector<1x128xf32>, vector<128x3xf32>, vector<1x3xf32> -> vector<1x3xf32>
    %c0_75 = arith.constant 0 : index
    %c0_76 = arith.constant 0 : index
    %109 = vector.load %arg8[%c0_75, %c0_76] : memref<1x3xf32, #tpu.memory_space<vmem>>, vector<1x3xf32>
    %110 = arith.addf %108, %109 : vector<1x3xf32>
    %c0_77 = arith.constant 0 : index
    %c0_78 = arith.constant 0 : index
    %c0_79 = arith.constant 0 : index
    %111 = vector.load %arg9[%c0_77, %c0_78, %c0_79] : memref<1x1x3xf32, #tpu.memory_space<vmem>>, vector<1x1x3xf32>
    %112 = vector.shape_cast %111 : vector<1x1x3xf32> to vector<1x3xf32>
    %113 = vector.shape_cast %110 : vector<1x3xf32> to vector<1x1x3xf32>
    tpu.vector_store %arg9[%c0_77, %c0_78, %c0_79], %113 {strides = array<i32>} : memref<1x1x3xf32, #tpu.memory_space<vmem>>, vector<1x1x3xf32>,
    return
  }
  func.func @transform_0(%arg0: i32) -> (i32, i32, i32) {
    %c0_i32 = arith.constant 0 : i32
    %c0_i32_0 = arith.constant 0 : i32
    %c0_i32_1 = arith.constant 0 : i32
    return %arg0, %c0_i32, %c0_i32_0 : i32, i32, i32
  }
  func.func @transform_1(%arg0: i32) -> (i32, i32, i32) {
    %c0_i32 = arith.constant 0 : i32
    %c0_i32_0 = arith.constant 0 : i32
    %c0_i32_1 = arith.constant 0 : i32
    %c0_i32_2 = arith.constant 0 : i32
    return %c0_i32, %c0_i32_0, %c0_i32_1 : i32, i32, i32
  }
  func.func @transform_2(%arg0: i32) -> (i32, i32, i32) {
    %c0_i32 = arith.constant 0 : i32
    %c0_i32_0 = arith.constant 0 : i32
    %c0_i32_1 = arith.constant 0 : i32
    %c0_i32_2 = arith.constant 0 : i32
    return %c0_i32, %c0_i32_0, %c0_i32_1 : i32, i32, i32
  }
  func.func @transform_3(%arg0: i32) -> (i32, i32) {
    %c0_i32 = arith.constant 0 : i32
    %c0_i32_0 = arith.constant 0 : i32
    %c0_i32_1 = arith.constant 0 : i32
    return %c0_i32, %c0_i32_0 : i32, i32
  }
  func.func @transform_4(%arg0: i32) -> (i32, i32) {
    %c0_i32 = arith.constant 0 : i32
    %c0_i32_0 = arith.constant 0 : i32
    %c0_i32_1 = arith.constant 0 : i32
    return %c0_i32, %c0_i32_0 : i32, i32
  }
  func.func @transform_5(%arg0: i32) -> (i32, i32) {
    %c0_i32 = arith.constant 0 : i32
    %c0_i32_0 = arith.constant 0 : i32
    %c0_i32_1 = arith.constant 0 : i32
    return %c0_i32, %c0_i32_0 : i32, i32
  }
  func.func @transform_6(%arg0: i32) -> (i32, i32) {
    %c0_i32 = arith.constant 0 : i32
    %c0_i32_0 = arith.constant 0 : i32
    %c0_i32_1 = arith.constant 0 : i32
    return %c0_i32, %c0_i32_0 : i32, i32
  }
  func.func @transform_7(%arg0: i32) -> (i32, i32) {
    %c0_i32 = arith.constant 0 : i32
    %c0_i32_0 = arith.constant 0 : i32
    %c0_i32_1 = arith.constant 0 : i32
    return %c0_i32, %c0_i32_0 : i32, i32
  }
  func.func @transform_8(%arg0: i32) -> (i32, i32, i32) {
    %c0_i32 = arith.constant 0 : i32
    %c0_i32_0 = arith.constant 0 : i32
    %c0_i32_1 = arith.constant 0 : i32
    return %arg0, %c0_i32, %c0_i32_0 : i32, i32, i32
  }
}

</mosaic_0001>

<bundles_post_ra>
// kernel: classifier_forward.1
= control target key start
LH: loop header
LB: loop body
LE: loop exit
PB: predicated region body
PF: predicated region fallthrough
CT: control target
= control target key end

     0   :  { %13 = vsyncpa [#allocation4], 0  ;;  %s4469_s0 = inlined_call_operand.vmem [shape: f32[2,496,62], index: 0, kind: input, shape index: {}]   ;;  %s4470_s1 = inlined_call_operand.vmem [shape: f32[3,36,496], index: 1, kind: input, shape index: {}]   ;;  %s4471_s2 = inlined_call_operand.vmem [shape: f32[3,62,12], index: 2, kind: input, shape index: {}]   ;;  %s4472_s3 = inlined_call_operand.vmem [shape: f32[36,12], index: 3, kind: input, shape index: {}]   ;;  %s4473_s4 = inlined_call_operand.vmem [shape: f32[432,128], index: 4, kind: input, shape index: {}]   ;;  %s4474_s5 = inlined_call_operand.vmem [shape: f32[1,128], index: 5, kind: input, shape index: {}]   ;;  %s4475_s6 = inlined_call_operand.vmem [shape: f32[128,3], index: 6, kind: input, shape index: {}]   ;;  %s4476_s7 = inlined_call_operand.vmem [shape: f32[1,3], index: 7, kind: input, shape index: {}]   ;;  %s4477_s8 = inlined_call_operand.hbm [shape: f32[2,1,3], index: 8, kind: output, shape index: {}]  }
   0x1   :  { %15 = vsyncpa [#allocation4 + $0x1], 0  ;;  %s2902_s27 = smov 0   ;;  %s2904_s28 = smov 0  }
   0x2   :  { %s2906_s29 = smov 0   ;;  %s2908_s30 = smov 0  }
   0x3 LB: > { %s2923_s9 = sadd.s32 4294967295, %s2820_s30   ;;  %s2228_s10 = sadd.s32 4294967294, %s2820_s30   ;;  %s2820_s30 = sphi %s2908_s30, %s4580_s30   ;;  %s2816_s29 = sphi %s2906_s29, %s4579_s29   ;;  %s2812_s28 = sphi %s2904_s28, %s4578_s28   ;;  %s2808_s27 = sphi %s2902_s27, %s4577_s27  }
   0x4   : > { %s2927_s11 = sadd.s32 1, %s2820_s30   ;;  %s201_s12 = sadd.s32 1, %s2816_s29 }
   0x5   : > { %s198_s13 = ssub.s32 %s2820_s30, %s2927_s11  ;;  %p211_p0 = scmp.ne.s32.totalorder %s2816_s29, %s2812_s28 }
   0x6   : > { %p199_p1 = scmp.eq.s32.totalorder %s198_s13, 0  ;;  %p212_p2 = scmp.eq.s32.totalorder %s2923_s9, 1 }
   0x7   : > { %p217_p3 = scmp.ne.s32.totalorder %s2812_s28, %s2808_s27  ;;  %p218_p4 = scmp.eq.s32.totalorder %s2228_s10, 1 }
   0x8   : > { %s2938_s14 = scalar_select %p199_p1, %s2816_s29, %s201_s12  }
   0x9   : > { %p2940_p5 = por %p212_p2, %p211_p0  ;;  %p2944_p6 = por %p218_p4, %p217_p3 }
   0xa   : > { %p2231_p7 = scmp.ge.s32.totalorder %s2820_s30, 1  ;;  %p265_p8 = scmp.lt.s32.totalorder %s2820_s30, 3 }
   0xc   : > { %p266_p9 = pnand %p2231_p7, %p265_p8 }
   0xe   : > { %269 = sbr.rel (%p266_p9) target bundleno = 1399 (0x577), region = 52 }
  0x13   : > { %p298_p10 = scmp.lt.s32.totalorder %s2923_s9, 1  ;;  %v366_v0 = vld [vmem:[%s4470_s1 + $0x8] sm:$0xff]  ;;  %v368_v1 = vld [vmem:[%s4470_s1 + $0x18] sm:$0xff]  ;;  %vm385_vm0 = vcmask 916480   ;;  %v2822_v2 = vmov 0.0   ;;  %v365_v54 = vld [vmem:[%s4470_s1] sm:$0xff] }
  0x14   : > { %491 = vmatprep.subr.mxu1 %v2822_v2  ;;  %465 = vmatprep.mubr.f32.mxu0 %v366_v0  ;;  %v370_v63 = vld [vmem:[%s4470_s1 + $0x28] sm:$0xff]  ;;  %vm830_vm1 = vcmask 1045504   ;;  %vm4483_vm2 = vmmov 0   ;;  %vm814_vm3 = vcmask 506880   ;;  %s2826_s26 = smov 12   ;;  %s2827_s13 = smov 36  }
  0x15   : > { %s299_s21 = scalar_select %p298_p10, %s2923_s9, 1  ;;  %2233 = vmatprep.mubr.msk.f32.mxu1 %vm385_vm0, %v368_v1  ;;  %v369_v1 = vld [vmem:[%s4470_s1 + $0x20] sm:$0xff] }
  0x16   : > { %s2828_s17 = smov 24   ;;  %s2829_s18 = smov 72  }
  0x17   : > { %s2686_s22 = smul.u32 496, %s299_s21  ;;  %s2830_s19 = smov 60  }
  0x18   : > { %s2832_s23 = smov 96   ;;  %s2833_s24 = smov 108  }
  0x19   : > { %s2963_s25 = scalar_lea.vmem %s4469_s0, %s2686_s22  ;;  %s2831_s22 = smov 120  }
  0x1a   : > { %v2966_v3 = vld [vmem:[%s2963_s25 + $0x178] sm:$0xff]  ;;  %v2969_v4 = vld [vmem:[%s2963_s25 + $0x170] sm:$0xff]  ;;  %v2974_v5 = vld [vmem:[%s2963_s25 + $0x168] sm:$0xff]  ;;  %s2838_s12 = smov 28   ;;  %s2843_s10 = smov 100  }
  0x1b   : > { %492 = vmatpush1.msra.mxu1 %v2966_v3  ;;  %v2979_v6 = vld [vmem:[%s2963_s25 + $0x160] sm:$0xff]  ;;  %v2982_v7 = vld [vmem:[%s2963_s25 + $0xf8] sm:$0xff]  ;;  %v2990_v9 = vld [vmem:[%s2963_s25 + $0xf0] sm:$0xff]  ;;  %s2846_s21 = smov 124   ;;  %s2851_s20 = smov 80  }
  0x1c   : > { %493 = vmatprep.subr.mxu1 %v2822_v2  ;;  %v2985_v8 = vld [vmem:[%s2963_s25 + $0x78] sm:$0xff]  ;;  %2326 = vmatprep.subr.mxu0 %v2982_v7  ;;  %v2993_v10 = vld [vmem:[%s2963_s25 + $0x70] sm:$0xff]  ;;  %v3001_v12 = vld [vmem:[%s2963_s25 + $0xe8] sm:$0xff] }
  0x1d   : > { %494 = vmatpush1.msra.mxu1 %v2969_v4  ;;  %v2997_v11 = vld [vmem:[%s2963_s25 + $0x158] sm:$0xff]  ;;  %2327 = vmatpush3.msra.mxu0 %v2985_v8  ;;  %v3006_v13 = vld [vmem:[%s2963_s25 + $0x68] sm:$0xff]  ;;  %v3010_v14 = vld [vmem:[%s2963_s25 + $0x150] sm:$0xff] }
  0x1e   : > { %495 = vmatprep.subr.mxu1 %v2822_v2  ;;  %2328 = vmatprep.subr.mxu0 %v2990_v9  ;;  %v3014_v15 = vld [vmem:[%s2963_s25 + $0xe0] sm:$0xff]  ;;  %v3023_v17 = vld [vmem:[%s2963_s25 + $0x148] sm:$0xff]  ;;  %v3027_v18 = vld [vmem:[%s2963_s25 + $0xd8] sm:$0xff] }
  0x1f   : > { %496 = vmatpush1.msra.mxu1 %v2974_v5  ;;  %2329 = vmatpush3.msra.mxu0 %v2993_v10  ;;  %v3019_v16 = vld [vmem:[%s2963_s25 + $0x60] sm:$0xff]  ;;  %v3032_v19 = vld [vmem:[%s2963_s25 + $0x58] sm:$0xff]  ;;  %v3040_v21 = vld [vmem:[%s2963_s25 + $0xd0] sm:$0xff] }
  0x20   : > { %497 = vmatprep.subr.mxu1 %v2822_v2  ;;  %2330 = vmatprep.subr.mxu0 %v3001_v12  ;;  %v3036_v20 = vld [vmem:[%s2963_s25 + $0x140] sm:$0xff]  ;;  %v3045_v22 = vld [vmem:[%s2963_s25 + $0x50] sm:$0xff]  ;;  %v3049_v23 = vld [vmem:[%s2963_s25 + $0x138] sm:$0xff] }
  0x21   : > { %498 = vmatpush1.msra.mxu1 %v2979_v6  ;;  %2331 = vmatpush3.msra.mxu0 %v3006_v13  ;;  %v3053_v24 = vld [vmem:[%s2963_s25 + $0xc8] sm:$0xff]  ;;  %v3062_v26 = vld [vmem:[%s2963_s25 + $0x130] sm:$0xff]  ;;  %v3066_v27 = vld [vmem:[%s2963_s25 + $0xc0] sm:$0xff] }
  0x22   : > { %499 = vmatprep.subr.mxu1 %v2822_v2  ;;  %2332 = vmatprep.subr.mxu0 %v3014_v15  ;;  %v3058_v25 = vld [vmem:[%s2963_s25 + $0x48] sm:$0xff]  ;;  %4494 = vst [vmem:[#allocation7_spill] sm:$0xff] %v3066_v27  ;;  %v3071_v28 = vld [vmem:[%s2963_s25 + $0x40] sm:$0xff]  ;;  %v3079_v30 = vld [vmem:[%s2963_s25 + $0xb8] sm:$0xff] }
  0x23   : > { %500 = vmatpush1.msra.mxu1 %v2997_v11  ;;  %2333 = vmatpush3.msra.mxu0 %v3019_v16  ;;  %4493 = vst [vmem:[#allocation6_spill] sm:$0xff] %v3058_v25  ;;  %v3075_v29 = vld [vmem:[%s2963_s25 + $0x128] sm:$0xff]  ;;  %4495 = vst [vmem:[#allocation8_spill] sm:$0xff] %v3079_v30  ;;  %v3084_v31 = vld [vmem:[%s2963_s25 + $0x38] sm:$0xff] }
  0x24   : > { %501 = vmatprep.subr.mxu1 %v2822_v2  ;;  %2334 = vmatprep.subr.mxu0 %v3027_v18  ;;  %v3088_v32 = vld [vmem:[%s2963_s25 + $0x120] sm:$0xff]  ;;  %v3092_v33 = vld [vmem:[%s2963_s25 + $0xb0] sm:$0xff]  ;;  %v3101_v35 = vld [vmem:[%s2963_s25 + $0x118] sm:$0xff] }
  0x25   : > { %502 = vmatpush1.msra.mxu1 %v3010_v14  ;;  %2335 = vmatpush3.msra.mxu0 %v3032_v19  ;;  %4496 = vst [vmem:[#allocation9_spill] sm:$0xff] %v3092_v33  ;;  %v3097_v34 = vld [vmem:[%s2963_s25 + $0x30] sm:$0xff]  ;;  %v3105_v36 = vld [vmem:[%s2963_s25 + $0xa8] sm:$0xff]  ;;  %v3118_v39 = vld [vmem:[%s2963_s25 + $0xa0] sm:$0xff] }
  0x26   : > { %503 = vmatprep.subr.mxu1 %v2822_v2  ;;  %2336 = vmatprep.subr.mxu0 %v3040_v21  ;;  %v3110_v37 = vld [vmem:[%s2963_s25 + $0x28] sm:$0xff]  ;;  %v3114_v38 = vld [vmem:[%s2963_s25 + $0x110] sm:$0xff]  ;;  %v3123_v40 = vld [vmem:[%s2963_s25 + $0x20] sm:$0xff] }
  0x27   : > { %504 = vmatpush1.msra.mxu1 %v3023_v17  ;;  %2337 = vmatpush3.msra.mxu0 %v3045_v22  ;;  %v3127_v41 = vld [vmem:[%s2963_s25 + $0x108] sm:$0xff]  ;;  %v3131_v42 = vld [vmem:[%s2963_s25 + $0x98] sm:$0xff]  ;;  %v3140_v44 = vld [vmem:[%s2963_s25 + $0x100] sm:$0xff] }
  0x28   : > { %505 = vmatprep.subr.mxu1 %v2822_v2  ;;  %2338 = vmatprep.subr.mxu0 %v3053_v24  ;;  %v3136_v43 = vld [vmem:[%s2963_s25 + $0x18] sm:$0xff]  ;;  %v3144_v45 = vld [vmem:[%s2963_s25 + $0x90] sm:$0xff]  ;;  %v3153_v47 = vld [vmem:[%s2963_s25 + $0x1e8] sm:$0xff] }
  0x29   : > { %506 = vmatpush1.msra.mxu1 %v3036_v20  ;;  %2339 = vmatpush3.msra.mxu0 %v3058_v25  ;;  %v3149_v46 = vld [vmem:[%s2963_s25 + $0x10] sm:$0xff]  ;;  %v3157_v48 = vld [vmem:[%s2963_s25 + $0x88] sm:$0xff]  ;;  %v3166_v50 = vld [vmem:[%s2963_s25 + $0x1e0] sm:$0xff] }
  0x2a   : > { %507 = vmatprep.subr.mxu1 %v2822_v2  ;;  %2340 = vmatprep.subr.mxu0 %v3066_v27  ;;  %v3162_v49 = vld [vmem:[%s2963_s25 + $0x8] sm:$0xff]  ;;  %v3170_v51 = vld [vmem:[%s2963_s25 + $0x80] sm:$0xff]  ;;  %v3179_v53 = vld [vmem:[%s2963_s25 + $0x1d8] sm:$0xff] }
  0x2b   : > { %508 = vmatpush1.msra.mxu1 %v3049_v23  ;;  %2341 = vmatpush3.msra.mxu0 %v3071_v28  ;;  %v3175_v52 = vld [vmem:[%s2963_s25] sm:$0xff]  ;;  %v3189_v55 = vld [vmem:[%s2963_s25 + $0x1d0] sm:$0xff]  ;;  %v3195_v56 = vld [vmem:[%s2963_s25 + $0x1c8] sm:$0xff] }
  0x2c   : > { %509 = vmatprep.subr.mxu1 %v2822_v2  ;;  %2342 = vmatprep.subr.mxu0 %v3079_v30  ;;  %4497 = vst [vmem:[#allocation10_spill] sm:$0xff] %v3175_v52  ;;  %v3202_v57 = vld [vmem:[%s2963_s25 + $0x1c0] sm:$0xff]  ;;  %v3209_v58 = vld [vmem:[%s2963_s25 + $0x1b8] sm:$0xff]  ;;  %v3216_v59 = vld [vmem:[%s2963_s25 + $0x1b0] sm:$0xff] }
  0x2d   : > { %510 = vmatpush1.msra.mxu1 %v3062_v26  ;;  %2343 = vmatpush3.msra.mxu0 %v3084_v31  ;;  %v3223_v60 = vld [vmem:[%s2963_s25 + $0x1a8] sm:$0xff]  ;;  %v3230_v61 = vld [vmem:[%s2963_s25 + $0x1a0] sm:$0xff]  ;;  %v3237_v62 = vld [vmem:[%s2963_s25 + $0x198] sm:$0xff] }
  0x2e   : > { %511 = vmatprep.subr.mxu1 %v2822_v2  ;;  %2344 = vmatprep.subr.mxu0 %v3092_v33  ;;  %v3247_v0 = vld [vmem:[%s2963_s25 + $0x190] sm:$0xff] }
  0x2f   : > { %512 = vmatpush1.msra.mxu1 %v3075_v29  ;;  %2345 = vmatpush3.msra.mxu0 %v3097_v34 }
  0x30   : > { %513 = vmatprep.subr.mxu1 %v2822_v2  ;;  %2346 = vmatprep.subr.mxu0 %v3105_v36 }
  0x31   : > { %514 = vmatpush1.msra.mxu1 %v3088_v32  ;;  %2347 = vmatpush3.msra.mxu0 %v3110_v37 }
  0x32   : > { %515 = vmatprep.subr.mxu1 %v2822_v2  ;;  %2348 = vmatprep.subr.mxu0 %v3118_v39 }
  0x33   : > { %516 = vmatpush1.msra.mxu1 %v3101_v35  ;;  %2349 = vmatpush3.msra.mxu0 %v3123_v40 }
  0x34   : > { %517 = vmatprep.subr.mxu1 %v2822_v2  ;;  %2350 = vmatprep.subr.mxu0 %v3131_v42 }
  0x35   : > { %518 = vmatpush1.msra.mxu1 %v3114_v38  ;;  %2351 = vmatpush3.msra.mxu0 %v3136_v43 }
  0x36   : > { %519 = vmatprep.subr.mxu1 %v2822_v2  ;;  %2352 = vmatprep.subr.mxu0 %v3144_v45 }
  0x37   : > { %520 = vmatpush1.msra.mxu1 %v3127_v41  ;;  %2353 = vmatpush3.msra.mxu0 %v3149_v46 }
  0x38   : > { %521 = vmatprep.subr.mxu1 %v2822_v2  ;;  %2354 = vmatprep.subr.mxu0 %v3157_v48 }
  0x39   : > { %522 = vmatpush1.msra.mxu1 %v3140_v44  ;;  %2355 = vmatpush3.msra.mxu0 %v3162_v49 }
  0x3a   : > { %527 = vmatprep.subr.mxu1 %v2822_v2  ;;  %2356 = vmatprep.subr.mxu0 %v3170_v51 }
  0x3b   : > { %528 = vmatpush2.msra.mxu1 %v3153_v47  ;;  %2357 = vmatpush3.msra.mxu0 %v3175_v52 }
  0x3c   : > { %529 = vmatprep.subr.mxu1 %v2822_v2  ;;  %466 = vmatmul.mubr.f32.vlgmr.msra.gmra.mxu0 %v365_v54  ;;  %v3256_v54 = vld [vmem:[%s2963_s25 + $0x188] sm:$0xff] }
  0x3d   : > { %530 = vmatpush2.msra.mxu1 %v3166_v50  ;;  %2373 = vmatprep.subr.mxu0 %v2982_v7 }
  0x3e   : > { %531 = vmatprep.subr.mxu1 %v2822_v2  ;;  %2374 = vmatpush3.msra.mxu0 %v2985_v8 }
  0x3f   : > { %532 = vmatpush2.msra.mxu1 %v3179_v53  ;;  %2375 = vmatprep.subr.mxu0 %v2990_v9 }
  0x40   : > { %533 = vmatprep.subr.mxu1 %v2822_v2  ;;  %2376 = vmatpush3.msra.mxu0 %v2993_v10 }
  0x41   : > { %534 = vmatpush2.msra.mxu1 %v3189_v55  ;;  %2377 = vmatprep.subr.mxu0 %v3001_v12 }
  0x42   : > { %535 = vmatprep.subr.mxu1 %v2822_v2  ;;  %2378 = vmatpush3.msra.mxu0 %v3006_v13 }
  0x43   : > { %536 = vmatpush2.msra.mxu1 %v3195_v56  ;;  %2379 = vmatprep.subr.mxu0 %v3014_v15 }
  0x44   : > { %537 = vmatprep.subr.mxu1 %v2822_v2  ;;  %2380 = vmatpush3.msra.mxu0 %v3019_v16 }
  0x45   : > { %538 = vmatpush2.msra.mxu1 %v3202_v57  ;;  %2381 = vmatprep.subr.mxu0 %v3027_v18 }
  0x46   : > { %539 = vmatprep.subr.mxu1 %v2822_v2  ;;  %2382 = vmatpush3.msra.mxu0 %v3032_v19 }
  0x47   : > { %540 = vmatpush2.msra.mxu1 %v3209_v58  ;;  %2383 = vmatprep.subr.mxu0 %v3040_v21 }
  0x48   : > { %541 = vmatprep.subr.mxu1 %v2822_v2  ;;  %2384 = vmatpush3.msra.mxu0 %v3045_v22 }
  0x49   : > { %542 = vmatpush2.msra.mxu1 %v3216_v59  ;;  %2385 = vmatprep.subr.mxu0 %v3053_v24 }
  0x4a   : > { %543 = vmatprep.subr.mxu1 %v2822_v2  ;;  %2386 = vmatpush3.msra.mxu0 %v3058_v25  ;;  %v3262_v25 = vld [vmem:[%s2963_s25 + $0x180] sm:$0xff]  ;;  %s2825_s25 = smov 48  }
  0x4b   : > { %544 = vmatpush2.msra.mxu1 %v3223_v60  ;;  %2387 = vmatprep.subr.mxu0 %v3066_v27  ;;  %v374_v27 = vld [vmem:[%s4470_s1 + $0x48] sm:$0xff] }
  0x4c   : > { %545 = vmatprep.subr.mxu1 %v2822_v2  ;;  %470 = vmatprep.mubr.f32.mxu0 %v370_v63  ;;  %v367_v63 = vld [vmem:[%s4470_s1 + $0x10] sm:$0xff] }
  0x4d   : > { %546 = vmatpush2.msra.mxu1 %v3230_v61  ;;  %2388 = vmatpush3.msra.mxu0 %v3071_v28 }
  0x4e   : > { %547 = vmatprep.subr.mxu1 %v2822_v2  ;;  %471 = vmatmul.mubr.f32.gmra.mxu0 %v369_v1  ;;  %v372_v1 = vld [vmem:[%s4470_s1 + $0x38] sm:$0xff] }
  0x4f   : > { %548 = vmatpush2.msra.mxu1 %v3237_v62  ;;  %2389 = vmatprep.subr.mxu0 %v3079_v30  ;;  %v373_v30 = vld [vmem:[%s4470_s1 + $0x40] sm:$0xff] }
  0x50   : > { %549 = vmatprep.subr.mxu1 %v2822_v2  ;;  %2390 = vmatpush3.msra.mxu0 %v3084_v31 }
  0x51   : > { %550 = vmatpush2.msra.mxu1 %v3247_v0  ;;  %2391 = vmatprep.subr.mxu0 %v3092_v33  ;;  %v371_v33 = vld [vmem:[%s4470_s1 + $0x30] sm:$0xff] }
  0x52   : > { %551 = vmatprep.subr.mxu1 %v2822_v2  ;;  %475 = vmatprep.mubr.f32.mxu0 %v374_v27  ;;  %v378_v27 = vld [vmem:[%s4470_s1 + $0x68] sm:$0xff] }
  0x53   : > { %552 = vmatpush2.msra.mxu1 %v3256_v54  ;;  %2392 = vmatpush3.msra.mxu0 %v3097_v34 }
  0x54   : > { %553 = vmatprep.subr.mxu1 %v2822_v2  ;;  %476 = vmatmul.mubr.f32.gmra.mxu0 %v373_v30  ;;  %v377_v30 = vld [vmem:[%s4470_s1 + $0x60] sm:$0xff] }
  0x55   : > { %554 = vmatpush2.msra.mxu1 %v3262_v25  ;;  %2393 = vmatprep.subr.mxu0 %v3105_v36 }
  0x56   : > { %556 = vmatmul.mubr.f32.vlgmr.msra.gmra.mxu1 %v367_v63  ;;  %715 = vmatprep.subr.mxu1 %v2822_v2  ;;  %v376_v63 = vld [vmem:[%s4470_s1 + $0x58] sm:$0xff] }
  0x57   : > { %716 = vmatpush1.msra.mxu1 %v2966_v3  ;;  %2234 = vmatprep.mubr.msk.f32.mxu1 %vm385_vm0, %v372_v1  ;;  %v382_v1 = vld [vmem:[%s4470_s1 + $0x88] sm:$0xf] }
  0x58   : > { %717 = vmatprep.subr.mxu1 %v2822_v2  ;;  %2394 = vmatpush3.msra.mxu0 %v3110_v37 }
  0x59   : > { %718 = vmatpush1.msra.mxu1 %v2969_v4  ;;  %2395 = vmatprep.subr.mxu0 %v3118_v39 }
  0x5a   : > { %719 = vmatprep.subr.mxu1 %v2822_v2  ;;  %561 = vmatmul.mubr.f32.gmra.mxu1 %v371_v33  ;;  %v375_v33 = vld [vmem:[%s4470_s1 + $0x50] sm:$0xff] }
  0x5b   : > { %720 = vmatpush1.msra.mxu1 %v2974_v5  ;;  %480 = vmatprep.mubr.f32.mxu0 %v378_v27  ;;  %v380_v27 = vld [vmem:[%s4470_s1 + $0x78] sm:$0xff] }
  0x5c   : > { %721 = vmatprep.subr.mxu1 %v2822_v2  ;;  %2235 = vmatprep.mubr.msk.f32.mxu1 %vm385_vm0, %v376_v63  ;;  %v381_v63 = vld [vmem:[%s4470_s1 + $0x80] sm:$0xf] }
  0x5d   : > { %722 = vmatpush1.msra.mxu1 %v2979_v6  ;;  %2396 = vmatpush3.msra.mxu0 %v3123_v40 }
  0x5e   : > { %723 = vmatprep.subr.mxu1 %v2822_v2  ;;  %481 = vmatmul.mubr.f32.gmra.mxu0 %v377_v30  ;;  %v379_v30 = vld [vmem:[%s4470_s1 + $0x70] sm:$0xff] }
  0x5f   : > { %724 = vmatpush1.msra.mxu1 %v2997_v11  ;;  %2397 = vmatprep.subr.mxu0 %v3131_v42 }
  0x60   : > { %725 = vmatprep.subr.mxu1 %v2822_v2  ;;  %566 = vmatmul.mubr.f32.gmra.mxu1 %v375_v33  ;;  %v384_v33 = vld [vmem:[%s4470_s1 + $0x98] sm:$0xf] }
  0x61   : > { %726 = vmatpush1.msra.mxu1 %v3010_v14  ;;  %2398 = vmatpush3.msra.mxu0 %v3136_v43 }
  0x62   : > { %727 = vmatprep.subr.mxu1 %v2822_v2  ;;  %2399 = vmatprep.subr.mxu0 %v3144_v45 }
  0x63   : > { %728 = vmatpush1.msra.mxu1 %v3023_v17  ;;  %485 = vmatprep.mubr.f32.mxu0 %v382_v1  ;;  %v2239_v1 = vld [vmem:[%s4470_s1 + $0xa8] sm:$0xff] }
  0x64   : > { %729 = vmatprep.subr.mxu1 %v2822_v2  ;;  %2236 = vmatprep.mubr.msk.f32.mxu1 %vm385_vm0, %v380_v27  ;;  %v2238_v27 = vld [vmem:[%s4470_s1 + $0xa0] sm:$0xff] }
  0x65   : > { %730 = vmatpush1.msra.mxu1 %v3036_v20  ;;  %2400 = vmatpush3.msra.mxu0 %v3149_v46 }
  0x66   : > { %731 = vmatprep.subr.mxu1 %v2822_v2  ;;  %486 = vmatmul.mubr.f32.gmra.mxu0 %v381_v63  ;;  %v383_v63 = vld [vmem:[%s4470_s1 + $0x90] sm:$0xf] }
  0x67   : > { %732 = vmatpush1.msra.mxu1 %v3049_v23  ;;  %2401 = vmatprep.subr.mxu0 %v3157_v48 }
  0x68   : > { %733 = vmatprep.subr.mxu1 %v2822_v2  ;;  %571 = vmatmul.mubr.f32.gmra.mxu1 %v379_v30  ;;  %v2243_v30 = vld [vmem:[%s4470_s1 + $0xc8] sm:$0xff] }
  0x69   : > { %734 = vmatpush1.msra.mxu1 %v3062_v26  ;;  %2402 = vmatpush3.msra.mxu0 %v3162_v49 }
  0x6a   : > { %735 = vmatprep.subr.mxu1 %v2822_v2  ;;  %2403 = vmatprep.subr.mxu0 %v3170_v51 }
  0x6b   : > { %736 = vmatpush1.msra.mxu1 %v3075_v29  ;;  %2237 = vmatprep.mubr.msk.f32.mxu1 %vm385_vm0, %v384_v33  ;;  %v2241_v33 = vld [vmem:[%s4470_s1 + $0xb8] sm:$0xff] }
  0x6c   : > { %737 = vmatprep.subr.mxu1 %v2822_v2  ;;  %2404 = vmatpush3.msra.mxu0 %v3175_v52  ;;  %v2242_v52 = vld [vmem:[%s4470_s1 + $0xc0] sm:$0xff] }
  0x6d   : > { %738 = vmatpush1.msra.mxu1 %v3088_v32  ;;  %689 = vmatprep.mubr.f32.mxu0 %v2239_v1  ;;  %v2247_v1 = vld [vmem:[%s4470_s1 + $0xe8] sm:$0xff] }
  0x6e   : > { %739 = vmatprep.subr.mxu1 %v2822_v2  ;;  %690 = vmatmul.mubr.f32.vlgmr.msra.gmra.mxu0 %v2238_v27  ;;  %v2246_v27 = vld [vmem:[%s4470_s1 + $0xe0] sm:$0xff] }
  0x6f   : > { %740 = vmatpush1.msra.mxu1 %v3101_v35  ;;  %694 = vmatprep.mubr.f32.mxu0 %v2243_v30  ;;  %v2255_v30 = vld [vmem:[%s4470_s1 + $0x128] sm:$0xf] }
  0x70   : > { %741 = vmatprep.subr.mxu1 %v2822_v2  ;;  %576 = vmatmul.mubr.f32.gmra.mxu1 %v383_v63  ;;  %v2251_v63 = vld [vmem:[%s4470_s1 + $0x108] sm:$0xff] }
  0x71   : > { %742 = vmatpush1.msra.mxu1 %v3114_v38  ;;  %2258 = vmatprep.mubr.msk.f32.mxu1 %vm385_vm0, %v2241_v33  ;;  %v2254_v33 = vld [vmem:[%s4470_s1 + $0x120] sm:$0xf] }
  0x72   : > { %743 = vmatprep.subr.mxu1 %v2822_v2  ;;  %695 = vmatmul.mubr.f32.gmra.mxu0 %v2242_v52  ;;  %v2250_v52 = vld [vmem:[%s4470_s1 + $0x100] sm:$0xff] }
  0x73   : > { %744 = vmatpush1.msra.mxu1 %v3127_v41  ;;  %699 = vmatprep.mubr.f32.mxu0 %v2247_v1  ;;  %v2240_v1 = vld [vmem:[%s4470_s1 + $0xb0] sm:$0xff] }
  0x74   : > { %745 = vmatprep.subr.mxu1 %v2822_v2  ;;  %2558 = vmatprep.subr.mxu0 %v2822_v2 }
  0x75   : > { %746 = vmatpush1.msra.mxu1 %v3140_v44 }
  0x76   : > { %751 = vmatprep.subr.mxu1 %v2822_v2  ;;  %700 = vmatmul.mubr.f32.gmra.mxu0 %v2246_v27  ;;  %v2245_v27 = vld [vmem:[%s4470_s1 + $0xd8] sm:$0xff] }
  0x77   : > { %752 = vmatpush2.msra.mxu1 %v3153_v47  ;;  %704 = vmatprep.mubr.f32.mxu0 %v2251_v63  ;;  %v2244_v63 = vld [vmem:[%s4470_s1 + $0xd0] sm:$0xff] }
  0x78   : > { %753 = vmatprep.subr.mxu1 %v2822_v2 }
  0x79   : > { %754 = vmatpush2.msra.mxu1 %v3166_v50 }
  0x7a   : > { %755 = vmatprep.subr.mxu1 %v2822_v2  ;;  %705 = vmatmul.mubr.f32.gmra.mxu0 %v2250_v52  ;;  %v2249_v52 = vld [vmem:[%s4470_s1 + $0xf8] sm:$0xff] }
  0x7b   : > { %756 = vmatpush2.msra.mxu1 %v3179_v53  ;;  %709 = vmatprep.mubr.f32.mxu0 %v2255_v30  ;;  %v2248_v30 = vld [vmem:[%s4470_s1 + $0xf0] sm:$0xff] }
  0x7c   : > { %757 = vmatprep.subr.mxu1 %v2822_v2 }
  0x7d   : > { %758 = vmatpush2.msra.mxu1 %v3189_v55 }
  0x7e   : > { %759 = vmatprep.subr.mxu1 %v2822_v2  ;;  %710 = vmatmul.mubr.f32.gmra.mxu0 %v2254_v33  ;;  %v2268_v33 = vld [vmem:[%s4471_s2 + $0x68] sm:$0xff] }
  0x7f   : > { %760 = vmatpush2.msra.mxu1 %v3195_v56  ;;  %2574 = vmatprep.mubr.msk.f32.mxu0 %vm4483_vm2, %v2822_v2 }
  0x80   : > { %761 = vmatprep.subr.mxu1 %v2822_v2 }
  0x81   : > { %762 = vmatpush2.msra.mxu1 %v3202_v57 }
  0x82   : > { %763 = vmatprep.subr.mxu1 %v2822_v2 }
  0x83   : > { %764 = vmatpush2.msra.mxu1 %v3209_v58 }
  0x84   : > { %765 = vmatprep.subr.mxu1 %v2822_v2 }
  0x85   : > { %766 = vmatpush2.msra.mxu1 %v3216_v59 }
  0x86   : > { %767 = vmatprep.subr.mxu1 %v2822_v2 }
  0x87   : > { %768 = vmatpush2.msra.mxu1 %v3223_v60 }
  0x88   : > { %769 = vmatprep.subr.mxu1 %v2822_v2 }
  0x89   : > { %770 = vmatpush2.msra.mxu1 %v3230_v61 }
  0x8a   : > { %771 = vmatprep.subr.mxu1 %v2822_v2 }
  0x8b   : > { %772 = vmatpush2.msra.mxu1 %v3237_v62 }
  0x8c   : > { %773 = vmatprep.subr.mxu1 %v2822_v2 }
  0x8d   : > { %774 = vmatpush2.msra.mxu1 %v3247_v0 }
  0x8e   : > { %775 = vmatprep.subr.mxu1 %v2822_v2 }
  0x8f   : > { %776 = vmatpush2.msra.mxu1 %v3256_v54 }
  0x90   : > { %777 = vmatprep.subr.mxu1 %v2822_v2 }
  0x91   : > { %778 = vmatpush2.msra.mxu1 %v3262_v25 }
  0x92   : > { %780 = vmatmul.mubr.f32.vlgmr.msra.gmra.mxu1 %v2240_v1  ;;  %1158 = vmatprep.subr.mxu1 %v2822_v2 }
  0x93   : > { %2259 = vmatprep.mubr.msk.f32.mxu1 %vm385_vm0, %v2245_v27  ;;  %1159 = vmatpush1.msra.mxu1 %v2966_v3  ;;  %v2253_v3 = vld [vmem:[%s4470_s1 + $0x118] sm:$0xff] }
  0x94   : > { %1160 = vmatprep.subr.mxu1 %v2822_v2 }
  0x95   : > { %1161 = vmatpush1.msra.mxu1 %v2969_v4  ;;  %v2252_v4 = vld [vmem:[%s4470_s1 + $0x110] sm:$0xff] }
  0x96   : > { %785 = vmatmul.mubr.f32.gmra.mxu1 %v2244_v63  ;;  %1162 = vmatprep.subr.mxu1 %v2822_v2 }
  0x97   : > { %2260 = vmatprep.mubr.msk.f32.mxu1 %vm385_vm0, %v2249_v52  ;;  %1163 = vmatpush1.msra.mxu1 %v2974_v5  ;;  %v2270_v5 = vld [vmem:[%s4471_s2 + $0x78] sm:$0x3f] }
  0x98   : > { %1164 = vmatprep.subr.mxu1 %v2822_v2  ;;  %2559 = vmatpush3.msk.msra.mxu0 %vm830_vm1, %v2270_v5 }
  0x99   : > { %1165 = vmatpush1.msra.mxu1 %v2979_v6  ;;  %v2257_v6 = vld [vmem:[%s4470_s1 + $0x138] sm:$0xf]  ;;  %2560 = vmatprep.subr.mxu0 %v2822_v2 }
  0x9a   : > { %790 = vmatmul.mubr.f32.gmra.mxu1 %v2248_v30  ;;  %1166 = vmatprep.subr.mxu1 %v2822_v2 }
  0x9b   : > { %2261 = vmatprep.mubr.msk.f32.mxu1 %vm385_vm0, %v2253_v3  ;;  %1167 = vmatpush1.msra.mxu1 %v2997_v11  ;;  %v2256_v11 = vld [vmem:[%s4470_s1 + $0x130] sm:$0xf] }
  0x9c   : > { %1168 = vmatprep.subr.mxu1 %v2822_v2 }
  0x9d   : > { %1169 = vmatpush1.msra.mxu1 %v3010_v14  ;;  %v2269_v14 = vld [vmem:[%s4471_s2 + $0x70] sm:$0xff] }
  0x9e   : > { %795 = vmatmul.mubr.f32.gmra.mxu1 %v2252_v4  ;;  %1170 = vmatprep.subr.mxu1 %v2822_v2 }
  0x9f   : > { %2262 = vmatprep.mubr.msk.f32.mxu1 %vm385_vm0, %v2257_v6  ;;  %1171 = vmatpush1.msra.mxu1 %v3023_v17  ;;  %v2267_v17 = vld [vmem:[%s4471_s2 + $0x60] sm:$0xff] }
  0xa0   : > { %1172 = vmatprep.subr.mxu1 %v2822_v2  ;;  %2561 = vmatpush3.msra.mxu0 %v2269_v14 }
  0xa1   : > { %1173 = vmatpush1.msra.mxu1 %v3036_v20  ;;  %2562 = vmatprep.subr.mxu0 %v2822_v2  ;;  %v2266_v20 = vld [vmem:[%s4471_s2 + $0x58] sm:$0xff] }
  0xa2   : > { %800 = vmatmul.mubr.f32.gmra.mxu1 %v2256_v11  ;;  %1174 = vmatprep.subr.mxu1 %v2822_v2 }
  0xa3   : > { %1175 = vmatpush1.msra.mxu1 %v3049_v23  ;;  %2563 = vmatpush3.msra.mxu0 %v2268_v33  ;;  %v2265_v23 = vld [vmem:[%s4471_s2 + $0x50] sm:$0xff] }
  0xa4   : > { %1176 = vmatprep.subr.mxu1 %v2822_v2  ;;  %2564 = vmatprep.subr.mxu0 %v2822_v2 }
  0xa5   : > { %1177 = vmatpush1.msra.mxu1 %v3062_v26  ;;  %2565 = vmatpush3.msra.mxu0 %v2267_v17  ;;  %v2264_v26 = vld [vmem:[%s4471_s2 + $0x48] sm:$0xff] }
  0xa6   : > { %1178 = vmatprep.subr.mxu1 %v2822_v2  ;;  %2566 = vmatprep.subr.mxu0 %v2822_v2 }
  0xa7   : > { %1179 = vmatpush1.msra.mxu1 %v3075_v29  ;;  %2567 = vmatpush3.msra.mxu0 %v2266_v20  ;;  %v2263_v29 = vld [vmem:[%s4471_s2 + $0x40] sm:$0xff] }
  0xa8   : > { %1180 = vmatprep.subr.mxu1 %v2822_v2  ;;  %2568 = vmatprep.subr.mxu0 %v2822_v2 }
  0xa9   : > { %1181 = vmatpush1.msra.mxu1 %v3088_v32  ;;  %2569 = vmatpush3.msra.mxu0 %v2265_v23  ;;  %v2286_v32 = vld [vmem:[%s4470_s1 + $0x158] sm:$0xff] }
  0xaa   : > { %1182 = vmatprep.subr.mxu1 %v2822_v2  ;;  %2570 = vmatprep.subr.mxu0 %v2822_v2 }
  0xab   : > { %1183 = vmatpush1.msra.mxu1 %v3101_v35  ;;  %2571 = vmatpush3.msra.mxu0 %v2264_v26  ;;  %v2290_v35 = vld [vmem:[%s4470_s1 + $0x178] sm:$0xff] }
  0xac   : > { %1184 = vmatprep.subr.mxu1 %v2822_v2  ;;  %2572 = vmatprep.subr.mxu0 %v2822_v2 }
  0xad   : > { %1185 = vmatpush1.msra.mxu1 %v3114_v38  ;;  %2573 = vmatpush3.msra.mxu0 %v2263_v29  ;;  %v2289_v38 = vld [vmem:[%s4470_s1 + $0x170] sm:$0xff] }
  0xae   : > { %1186 = vmatprep.subr.mxu1 %v2822_v2  ;;  %2589 = vmatprep.subr.mxu0 %v2822_v2 }
  0xaf   : > { %1187 = vmatpush1.msra.mxu1 %v3127_v41  ;;  %2303 = vmatprep.mubr.msk.f32.mxu1 %vm385_vm0, %v2286_v32  ;;  %v2294_v41 = vld [vmem:[%s4470_s1 + $0x198] sm:$0xff] }
  0xb0   : > { %1188 = vmatprep.subr.mxu1 %v2822_v2 }
  0xb1   : > { %1189 = vmatpush1.msra.mxu1 %v3140_v44 }
  0xb2   : > { %1194 = vmatprep.subr.mxu1 %v2822_v2 }
  0xb3   : > { %1195 = vmatpush2.msra.mxu1 %v3153_v47  ;;  %v2293_v47 = vld [vmem:[%s4470_s1 + $0x190] sm:$0xff] }
  0xb4   : > { %1196 = vmatprep.subr.mxu1 %v2822_v2 }
  0xb5   : > { %1197 = vmatpush2.msra.mxu1 %v3166_v50 }
  0xb6   : > { %1198 = vmatprep.subr.mxu1 %v2822_v2 }
  0xb7   : > { %1199 = vmatpush2.msra.mxu1 %v3179_v53  ;;  %v2298_v53 = vld [vmem:[%s4470_s1 + $0x1b8] sm:$0xff] }
  0xb8   : > { %1200 = vmatprep.subr.mxu1 %v2822_v2 }
  0xb9   : > { %1201 = vmatpush2.msra.mxu1 %v3189_v55 }
  0xba   : > { %1202 = vmatprep.subr.mxu1 %v2822_v2 }
  0xbb   : > { %1203 = vmatpush2.msra.mxu1 %v3195_v56 }
  0xbc   : > { %1204 = vmatprep.subr.mxu1 %v2822_v2 }
  0xbd   : > { %1205 = vmatpush2.msra.mxu1 %v3202_v57  ;;  %v2297_v57 = vld [vmem:[%s4470_s1 + $0x1b0] sm:$0xff] }
  0xbe   : > { %1206 = vmatprep.subr.mxu1 %v2822_v2 }
  0xbf   : > { %1207 = vmatpush2.msra.mxu1 %v3209_v58  ;;  %v2302_v58 = vld [vmem:[%s4470_s1 + $0x1d8] sm:$0xf] }
  0xc0   : > { %1208 = vmatprep.subr.mxu1 %v2822_v2 }
  0xc1   : > { %1209 = vmatpush2.msra.mxu1 %v3216_v59 }
  0xc2   : > { %1210 = vmatprep.subr.mxu1 %v2822_v2 }
  0xc3   : > { %1211 = vmatpush2.msra.mxu1 %v3223_v60 }
  0xc4   : > { %1212 = vmatprep.subr.mxu1 %v2822_v2 }
  0xc5   : > { %1213 = vmatpush2.msra.mxu1 %v3230_v61  ;;  %v2301_v61 = vld [vmem:[%s4470_s1 + $0x1d0] sm:$0xf] }
  0xc6   : > { %1214 = vmatprep.subr.mxu1 %v2822_v2 }
  0xc7   : > { %1215 = vmatpush2.msra.mxu1 %v3237_v62 }
  0xc8   : > { %1216 = vmatprep.subr.mxu1 %v2822_v2 }
  0xc9   : > { %1217 = vmatpush2.msra.mxu1 %v3247_v0 }
  0xca   : > { %1218 = vmatprep.subr.mxu1 %v2822_v2 }
  0xcb   : > { %1219 = vmatpush2.msra.mxu1 %v3256_v54 }
  0xcc   : > { %1220 = vmatprep.subr.mxu1 %v2822_v2 }
  0xcd   : > { %1221 = vmatpush2.msra.mxu1 %v3262_v25  ;;  %v2285_v25 = vld [vmem:[%s4470_s1 + $0x150] sm:$0xff] }
  0xce   : > { %2000 = vmatprep.subr.mxu1 %v2822_v2  ;;  %1223 = vmatmul.mubr.f32.vlgmr.msra.gmra.mxu1 %v2285_v25 }
  0xcf   : > { %2304 = vmatprep.mubr.msk.f32.mxu1 %vm385_vm0, %v2290_v35 }
  0xd2   : > { %1228 = vmatmul.mubr.f32.gmra.mxu1 %v2289_v38 }
  0xd3   : > { %2305 = vmatprep.mubr.msk.f32.mxu1 %vm385_vm0, %v2294_v41  ;;  %v588_v41 = vld [vmem:[%s4471_s2 + $0x38] sm:$0x3f] }
  0xd6   : > { %1233 = vmatmul.mubr.f32.gmra.mxu1 %v2293_v47 }
  0xd7   : > { %2306 = vmatprep.mubr.msk.f32.mxu1 %vm385_vm0, %v2298_v53 }
  0xda   : > { %1238 = vmatmul.mubr.f32.gmra.mxu1 %v2297_v57 }
  0xdb   : > { %2307 = vmatprep.mubr.msk.f32.mxu1 %vm385_vm0, %v2302_v58 }
  0xde   : > { %1243 = vmatmul.mubr.f32.gmra.mxu1 %v2301_v61 }
  0xfc   : > { %v3572_v44 = vpop.f32.mrf.mxu0 }
  0xfe   : > { %v3583_v55 = vpop.f32.mrf.mxu0 }
 0x10e   : > { %v3591_v59 = vpop.f32.mrf.mxu0 }
 0x110   : > { %v3599_v0 = vpop.f32.mrf.mxu0 }
 0x114   : > { %v3601_v54 = vpop.f32.mrf.mxu0 }
 0x116   : > { %v3577_v50 = vpop.f32.mrf.mxu1  ;;  %v3605_v63 = vpop.f32.mrf.mxu0 }
 0x118   : > { %v559_v56 = vpop.f32.mrf.mxu1 }
 0x119   : > { %v587_v56 = vld [vmem:[%s4471_s2 + $0x30] sm:$0xff] }
 0x11a   : > { %v3593_v60 = vpop.f32.mrf.mxu1 }
 0x11c   : > { %v564_v62 = vpop.f32.mrf.mxu1 }
 0x11d   : > { %v586_v62 = vld [vmem:[%s4471_s2 + $0x28] sm:$0xff] }
 0x11e   : > { %v3607_v52 = vpop.f32.mrf.mxu0 }
 0x120   : > { %v3603_v1 = vpop.f32.mrf.mxu1  ;;  %v3611_v4 = vpop.f32.mrf.mxu0 }
 0x122   : > { %v569_v27 = vpop.f32.mrf.mxu1 }
 0x126   : > { %v3613_v5 = vpop.f32.mrf.mxu0 }
 0x128   : > { %v3609_v30 = vpop.f32.mrf.mxu1  ;;  %v3617_v14 = vpop.f32.mrf.mxu0 }
 0x12a   : > { %v574_v3 = vpop.f32.mrf.mxu1 }
 0x12e   : > { %v2405_v33 = vpop.f32.mrf.mxu0 }
 0x130   : > { %v3615_v6 = vpop.f32.mrf.mxu1  ;;  %v2406_v17 = vpop.f32.mrf.mxu0 }
 0x131   : > { %v2407_v32 = vadd.f32 %v2406_v17, %v2405_v33 }
 0x132   : > { %v579_v11 = vpop.f32.mrf.mxu1  ;;  %v2408_v20 = vpop.f32.mrf.mxu0 }
 0x133   : > { %v585_v11 = vld [vmem:[%s4471_s2 + $0x20] sm:$0xff] }
 0x134   : > { %v2409_v23 = vpop.f32.mrf.mxu0 }
 0x135   : > { %v2410_v53 = vadd.f32 %v2409_v23, %v2408_v20  ;;  %v584_v23 = vld [vmem:[%s4471_s2 + $0x18] sm:$0xff] }
 0x136   : > { %v2411_v26 = vpop.f32.mrf.mxu0 }
 0x138   : > { %v2412_v29 = vpop.f32.mrf.mxu0 }
 0x139   : > { %v2413_v3 = vadd.f32 %v2412_v29, %v2411_v26 }
 0x13a   : > { %v2414_v35 = vpop.f32.mrf.mxu0 }
 0x13c   : > { %v2415_v58 = vpop.f32.mrf.mxu0 }
 0x13d   : > { %v2416_v29 = vadd.f32 %v2415_v58, %v2414_v35  ;;  %v582_v35 = vld [vmem:[%s4471_s2 + $0x8] sm:$0xff]  ;;  %v2360_v58 = vadd.f32 %v3583_v55, %v3572_v44 }
 0x13e   : > { %v2417_v17 = vpop.f32.mrf.mxu0  ;;  %v2309_v55 = vld [vmem:[%s4471_s2 + $0x88] sm:$0xff] }
 0x152   : > { %v781_v25 = vpop.f32.mrf.mxu1 }
 0x153   : > { %v782_v38 = vadd.f32 %v2407_v32, %v781_v25  ;;  %v583_v32 = vld [vmem:[%s4471_s2 + $0x10] sm:$0xff]  ;;  %v2418_v25 = vpop.f32.mrf.mxu0 }
 0x154   : > { %v783_v47 = vpop.f32.mrf.mxu1 }
 0x155   : > { %2575 = vmatmul.mubr.msk.f32.vlgmr.msra.gmra.mxu0 %vm814_vm3, %v782_v38 }
 0x156   : > { %2590 = vmatpush3.msk.msra.mxu0 %vm830_vm1, %v588_v41  ;;  %v786_v57 = vpop.f32.mrf.mxu1  ;;  %2577 = vmatprep.mubr.msk.f32.mxu0 %vm4483_vm2, %v2822_v2 }
 0x157   : > { %v787_v61 = vadd.f32 %v2410_v53, %v786_v57  ;;  %2591 = vmatprep.subr.mxu0 %v2822_v2  ;;  %v2419_v53 = vadd.f32 %v2418_v25, %v2417_v17 }
 0x158   : > { %v788_v27 = vpop.f32.mrf.mxu1  ;;  %2592 = vmatpush3.msra.mxu0 %v587_v56  ;;  %v581_v56 = vld [vmem:[%s4471_s2] sm:$0xff] }
 0x159   : > { %2578 = vmatmul.mubr.msk.f32.gmra.mxu0 %vm814_vm3, %v787_v61  ;;  %2593 = vmatprep.subr.mxu0 %v2822_v2  ;;  %v558_v27 = vadd.f32 %v2360_v58, %v3577_v50  ;;  %v2369_v50 = vadd.f32 %v3611_v4, %v3607_v52 }
 0x15a   : > { %v791_v33 = vpop.f32.mrf.mxu1  ;;  %2594 = vmatpush3.msra.mxu0 %v586_v62  ;;  %2580 = vmatprep.mubr.msk.f32.mxu0 %vm4483_vm2, %v2822_v2 }
 0x15b   : > { %v792_v20 = vadd.f32 %v2413_v3, %v791_v33  ;;  %2595 = vmatprep.subr.mxu0 %v2822_v2  ;;  %v2363_v3 = vadd.f32 %v3599_v0, %v3591_v59 }
 0x15c   : > { %v793_v26 = vpop.f32.mrf.mxu1  ;;  %2596 = vmatpush3.msra.mxu0 %v585_v11 }
 0x15d   : > { %2581 = vmatmul.mubr.msk.f32.gmra.mxu0 %vm814_vm3, %v792_v20  ;;  %2597 = vmatprep.subr.mxu0 %v2822_v2  ;;  %v563_v44 = vadd.f32 %v2363_v3, %v3593_v60  ;;  %v2308_v60 = vld [vmem:[%s4471_s2 + $0x80] sm:$0xff] }
 0x15e   : > { %v796_v38 = vpop.f32.mrf.mxu1  ;;  %2598 = vmatpush3.msra.mxu0 %v584_v23  ;;  %2583 = vmatprep.mubr.msk.f32.mxu0 %vm4483_vm2, %v2822_v2 }
 0x15f   : > { %v797_v41 = vadd.f32 %v2416_v29, %v796_v38  ;;  %2599 = vmatprep.subr.mxu0 %v2822_v2 }
 0x160   : > { %v798_v47 = vpop.f32.mrf.mxu1  ;;  %2600 = vmatpush3.msra.mxu0 %v583_v32 }
 0x161   : > { %2584 = vmatmul.mubr.msk.f32.gmra.mxu0 %vm814_vm3, %v797_v41  ;;  %2601 = vmatprep.subr.mxu0 %v2822_v2 }
 0x162   : > { %v801_v57 = vpop.f32.mrf.mxu1  ;;  %2586 = vmatprep.mubr.msk.f32.mxu0 %vm4483_vm2, %v2822_v2  ;;  %2602 = vmatpush3.msra.mxu0 %v582_v35 }
 0x163   : > { %v802_v61 = vadd.f32 %v2419_v53, %v801_v57  ;;  %2603 = vmatprep.subr.mxu0 %v2822_v2 }
 0x164   : > { %v803_v62 = vpop.f32.mrf.mxu1  ;;  %2604 = vmatpush3.msra.mxu0 %v581_v56 }
 0x165   : > { %2587 = vmatmul.mubr.msk.f32.gmra.mxu0 %vm814_vm3, %v802_v61  ;;  %2446 = vmatprep.subr.mxu0 %v2982_v7  ;;  %v2366_v7 = vadd.f32 %v3605_v63, %v3601_v54 }
 0x166   : > { %2605 = vmatprep.mubr.msk.f32.mxu0 %vm4483_vm2, %v2822_v2 }
 0x169   : > { %2606 = vmatmul.mubr.msk.f32.vlgmr.msra.gmra.mxu0 %vm814_vm3, %v558_v27 }
 0x16a   : > { %2447 = vmatpush3.msra.mxu0 %v2985_v8  ;;  %2608 = vmatprep.mubr.msk.f32.mxu0 %vm4483_vm2, %v2822_v2  ;;  %v568_v8 = vadd.f32 %v2366_v7, %v3603_v1 }
 0x16b   : > { %2448 = vmatprep.subr.mxu0 %v2990_v9  ;;  %v573_v9 = vadd.f32 %v2369_v50, %v3609_v30 }
 0x16c   : > { %2449 = vmatpush3.msra.mxu0 %v2993_v10  ;;  %v2372_v10 = vadd.f32 %v3617_v14, %v3613_v5 }
 0x16d   : > { %2450 = vmatprep.subr.mxu0 %v3001_v12  ;;  %2609 = vmatmul.mubr.msk.f32.gmra.mxu0 %vm814_vm3, %v563_v44  ;;  %v4498_v12 = vld [vmem:[#allocation6_spill] sm:$0xff] }
 0x16e   : > { %2451 = vmatpush3.msra.mxu0 %v3006_v13  ;;  %2611 = vmatprep.mubr.msk.f32.mxu0 %vm4483_vm2, %v2822_v2  ;;  %v578_v13 = vadd.f32 %v2372_v10, %v3615_v6 }
 0x16f   : > { %2452 = vmatprep.subr.mxu0 %v3014_v15  ;;  %v4499_v15 = vld [vmem:[#allocation7_spill] sm:$0xff] }
 0x170   : > { %2453 = vmatpush3.msra.mxu0 %v3019_v16  ;;  %v2284_v16 = vld [vmem:[%s4470_s1 + $0x148] sm:$0xff] }
 0x171   : > { %2454 = vmatprep.subr.mxu0 %v3027_v18  ;;  %2612 = vmatmul.mubr.msk.f32.gmra.mxu0 %vm814_vm3, %v568_v8  ;;  %v4500_v18 = vld [vmem:[#allocation8_spill] sm:$0xff] }
 0x172   : > { %2455 = vmatpush3.msra.mxu0 %v3032_v19  ;;  %2614 = vmatprep.mubr.msk.f32.mxu0 %vm4483_vm2, %v2822_v2  ;;  %v4501_v19 = vld [vmem:[#allocation9_spill] sm:$0xff] }
 0x173   : > { %2456 = vmatprep.subr.mxu0 %v3040_v21  ;;  %v2283_v21 = vld [vmem:[%s4470_s1 + $0x140] sm:$0xff] }
 0x174   : > { %2457 = vmatpush3.msra.mxu0 %v3045_v22  ;;  %v2288_v22 = vld [vmem:[%s4470_s1 + $0x168] sm:$0xff] }
 0x175   : > { %2458 = vmatprep.subr.mxu0 %v3053_v24  ;;  %2615 = vmatmul.mubr.msk.f32.gmra.mxu0 %vm814_vm3, %v573_v9  ;;  %v4502_v24 = vld [vmem:[#allocation10_spill] sm:$0xff] }
 0x176   : > { %2459 = vmatpush3.msra.mxu0 %v4498_v12  ;;  %2617 = vmatprep.mubr.msk.f32.mxu0 %vm4483_vm2, %v2822_v2 }
 0x177   : > { %2460 = vmatprep.subr.mxu0 %v4499_v15 }
 0x178   : > { %2461 = vmatpush3.msra.mxu0 %v3071_v28  ;;  %v2287_v28 = vld [vmem:[%s4470_s1 + $0x160] sm:$0xff] }
 0x179   : > { %2462 = vmatprep.subr.mxu0 %v4500_v18  ;;  %2618 = vmatmul.mubr.msk.f32.gmra.mxu0 %vm814_vm3, %v578_v13 }
 0x17a   : > { %2463 = vmatpush3.msra.mxu0 %v3084_v31  ;;  %1132 = vmatprep.mubr.f32.mxu0 %v2284_v16  ;;  %v2292_v31 = vld [vmem:[%s4470_s1 + $0x188] sm:$0xff] }
 0x17b   : > { %2464 = vmatprep.subr.mxu0 %v4501_v19 }
 0x17c   : > { %2465 = vmatpush3.msra.mxu0 %v3097_v34  ;;  %v2291_v34 = vld [vmem:[%s4470_s1 + $0x180] sm:$0xff] }
 0x17d   : > { %2466 = vmatprep.subr.mxu0 %v3105_v36  ;;  %v2296_v36 = vld [vmem:[%s4470_s1 + $0x1a8] sm:$0xff] }
 0x17e   : > { %2467 = vmatpush3.msra.mxu0 %v3110_v37  ;;  %v2295_v37 = vld [vmem:[%s4470_s1 + $0x1a0] sm:$0xff] }
 0x17f   : > { %2468 = vmatprep.subr.mxu0 %v3118_v39  ;;  %v2300_v39 = vld [vmem:[%s4470_s1 + $0x1c8] sm:$0xf] }
 0x180   : > { %2469 = vmatpush3.msra.mxu0 %v3123_v40  ;;  %v2299_v40 = vld [vmem:[%s4470_s1 + $0x1c0] sm:$0xf] }
 0x181   : > { %2470 = vmatprep.subr.mxu0 %v3131_v42  ;;  %v2315_v42 = vld [vmem:[%s4471_s2 + $0xb8] sm:$0x3f] }
 0x182   : > { %2471 = vmatpush3.msra.mxu0 %v3136_v43  ;;  %v2314_v43 = vld [vmem:[%s4471_s2 + $0xb0] sm:$0xff] }
 0x183   : > { %2472 = vmatprep.subr.mxu0 %v3144_v45  ;;  %v2313_v45 = vld [vmem:[%s4471_s2 + $0xa8] sm:$0xff] }
 0x184   : > { %2473 = vmatpush3.msra.mxu0 %v3149_v46  ;;  %v2312_v46 = vld [vmem:[%s4471_s2 + $0xa0] sm:$0xff] }
 0x185   : > { %2474 = vmatprep.subr.mxu0 %v3157_v48  ;;  %v2311_v48 = vld [vmem:[%s4471_s2 + $0x98] sm:$0xff] }
 0x186   : > { %2475 = vmatpush3.msra.mxu0 %v3162_v49  ;;  %v2310_v49 = vld [vmem:[%s4471_s2 + $0x90] sm:$0xff] }
 0x187   : > { %2476 = vmatprep.subr.mxu0 %v3170_v51 }
 0x188   : > { %2477 = vmatpush3.msra.mxu0 %v4502_v24 }
 0x189   : > { %1133 = vmatmul.mubr.f32.vlgmr.msra.gmra.mxu0 %v2283_v21  ;;  %2620 = vmatprep.subr.mxu0 %v2822_v2 }
 0x18a   : > { %1137 = vmatprep.mubr.f32.mxu0 %v2288_v22  ;;  %2621 = vmatpush3.msk.msra.mxu0 %vm830_vm1, %v2315_v42  ;;  %v1385_v42 = vlaneseq }
 0x18b   : > { %2622 = vmatprep.subr.mxu0 %v2822_v2 }
 0x18c   : > { %2623 = vmatpush3.msra.mxu0 %v2314_v43  ;;  %v2824_v43 = vmov 1966171168   ;;  %vm3823_vm4 = vcmp.lt.s32.totalorder %v1385_v42, 12  ;;  %vm4071_vm5 = vcmp.ge.s32.totalorder %v1385_v42, 12  ;;  %vm4076_vm6 = vcmp.lt.s32.totalorder %v1385_v42, 24 }
 0x18d   : > { %1138 = vmatmul.mubr.f32.gmra.mxu0 %v2287_v28  ;;  %2624 = vmatprep.subr.mxu0 %v2822_v2  ;;  %vm4484_vm7 = vmand %vm4071_vm5, %vm4076_vm6  ;;  %vm4085_vm8 = vcmp.ge.s32.totalorder %v1385_v42, 24  ;;  %vm4090_vm9 = vcmp.lt.s32.totalorder %v1385_v42, 36  ;;  %vm4095_vm10 = vcmp.ge.s32.totalorder %v1385_v42, 36  ;;  %vm4100_vm11 = vcmp.lt.s32.totalorder %v1385_v42, 48 }
 0x18e   : > { %1142 = vmatprep.mubr.f32.mxu0 %v2292_v31  ;;  %2625 = vmatpush3.msra.mxu0 %v2313_v45  ;;  %v1224_v51 = vpop.f32.mrf.mxu1  ;;  %v1392_v45 = vunpack.c.l.s4 %v2824_v43  ;;  %v1896_v43 = vld [vmem:[%s4473_s4 + $0x160] sm:$0xff]  ;;  %vm1454_vm12 = vcmp.ge.s32.totalorder %v1385_v42, 48  ;;  %vm1455_vm13 = vcmp.lt.s32.totalorder %v1385_v42, 60  ;;  %vm4487_vm14 = vmand %vm4085_vm8, %vm4090_vm9  ;;  %vm1469_vm0 = vcmp.ge.s32.totalorder %v1385_v42, 60 }
 0x18f   : > { %2626 = vmatprep.subr.mxu0 %v2822_v2  ;;  %vm4486_vm15 = vmand %vm4095_vm10, %vm4100_vm11  ;;  %vm1470_vm1 = vcmp.lt.s32.totalorder %v1385_v42, 72 }
 0x190   : > { %2627 = vmatpush3.msra.mxu0 %v2312_v46  ;;  %v1226_v59 = vpop.f32.mrf.mxu1  ;;  %v1393_v46 = vunpack.c.0.s8 %v1392_v45 }
 0x191   : > { %1143 = vmatmul.mubr.f32.gmra.mxu0 %v2291_v34  ;;  %2628 = vmatprep.subr.mxu0 %v2822_v2 }
 0x192   : > { %1147 = vmatprep.mubr.f32.mxu0 %v2296_v36  ;;  %2629 = vmatpush3.msra.mxu0 %v2311_v48  ;;  %v1229_v0 = vpop.f32.mrf.mxu1  ;;  %v3811_v48 = vshrl.u32 %v1385_v42, 7 }
 0x193   : > { %2630 = vmatprep.subr.mxu0 %v2822_v2 }
 0x194   : > { %2631 = vmatpush3.msra.mxu0 %v2310_v49  ;;  %v1231_v54 = vpop.f32.mrf.mxu1 }
 0x195   : > { %1148 = vmatmul.mubr.f32.gmra.mxu0 %v2295_v37  ;;  %2632 = vmatprep.subr.mxu0 %v2822_v2 }
 0x196   : > { %1152 = vmatprep.mubr.f32.mxu0 %v2300_v39  ;;  %2633 = vmatpush3.msra.mxu0 %v2309_v55  ;;  %v1234_v1 = vpop.f32.mrf.mxu1 }
 0x197   : > { %2634 = vmatprep.subr.mxu0 %v2822_v2 }
 0x198   : > { %2635 = vmatpush3.msra.mxu0 %v2308_v60  ;;  %v1236_v63 = vpop.f32.mrf.mxu1 }
 0x199   : > { %1153 = vmatmul.mubr.f32.gmra.mxu0 %v2299_v40 }
 0x19a   : > { %2636 = vmatprep.mubr.msk.f32.mxu0 %vm4483_vm2, %v2822_v2  ;;  %v1239_v52 = vpop.f32.mrf.mxu1 }
 0x19c   : > { %v1241_v30 = vpop.f32.mrf.mxu1 }
 0x19e   : > { %v1244_v4 = vpop.f32.mrf.mxu1 }
 0x1a0   : > { %v1246_v5 = vpop.f32.mrf.mxu1 }
 0x215   : > { %v900_v6 = vpop.f32.mrf.mxu0 }
 0x217   : > { %v2576_v14 = vpop.f32.mrf.mxu0 }
 0x219   : > { %v905_v11 = vpop.f32.mrf.mxu0 }
 0x21b   : > { %v2579_v33 = vpop.f32.mrf.mxu0 }
 0x21d   : > { %v910_v17 = vpop.f32.mrf.mxu0 }
 0x21f   : > { %v2582_v20 = vpop.f32.mrf.mxu0 }
 0x221   : > { %v915_v23 = vpop.f32.mrf.mxu0 }
 0x223   : > { %v2585_v26 = vpop.f32.mrf.mxu0 }
 0x225   : > { %v920_v29 = vpop.f32.mrf.mxu0 }
 0x227   : > { %v2588_v32 = vpop.f32.mrf.mxu0 }
 0x229   : > { %v1008_v25 = vpop.f32.mrf.mxu0 }
 0x22a   : > { %v1009_v38 = vadd.f32 %v1008_v25, %v900_v6 }
 0x22b   : > { %v2607_v41 = vpop.f32.mrf.mxu0 }
 0x22d   : > { %v1013_v35 = vpop.f32.mrf.mxu0 }
 0x22e   : > { %v1014_v47 = vadd.f32 %v1013_v35, %v905_v11 }
 0x22f   : > { %v2610_v53 = vpop.f32.mrf.mxu0 }
 0x231   : > { %v1018_v56 = vpop.f32.mrf.mxu0 }
 0x232   : > { %v3791_v57 = vadd.f32 %v1018_v56, %v910_v17  ;;  %v1374_v56 = vld [vmem:[%s4472_s3 + $0x20] sm:$0xf] }
 0x233   : > { %v2613_v58 = vpop.f32.mrf.mxu0 }
 0x235   : > { %v1023_v61 = vpop.f32.mrf.mxu0 }
 0x236   : > { %v3793_v62 = vadd.f32 %v1023_v61, %v915_v23 }
 0x237   : > { %v2616_v27 = vpop.f32.mrf.mxu0 }
 0x239   : > { %v1028_v3 = vpop.f32.mrf.mxu0 }
 0x23a   : > { %v3795_v44 = vadd.f32 %v1028_v3, %v920_v29 }
 0x23b   : > { %v2619_v7 = vpop.f32.mrf.mxu0 }
 0x249   : > { %v2478_v8 = vpop.f32.mrf.mxu0 }
 0x24b   : > { %v2479_v50 = vpop.f32.mrf.mxu0 }
 0x24c   : > { %v2480_v9 = vadd.f32 %v2479_v50, %v2478_v8 }
 0x24d   : > { %v2481_v10 = vpop.f32.mrf.mxu0 }
 0x24e   : > { %v1225_v12 = vadd.f32 %v2480_v9, %v1224_v51  ;;  %v1370_v51 = vld [vmem:[%s4472_s3] sm:$0xff] }
 0x24f   : > { %v2482_v13 = vpop.f32.mrf.mxu0 }
 0x250   : > { %v2483_v15 = vadd.f32 %v2482_v13, %v2481_v10  ;;  %2637 = vmatmul.mubr.msk.f32.vlgmr.msra.gmra.mxu0 %vm814_vm3, %v1225_v12 }
 0x251   : > { %v2484_v16 = vpop.f32.mrf.mxu0  ;;  %2639 = vmatprep.mubr.msk.f32.mxu0 %vm4483_vm2, %v2822_v2 }
 0x252   : > { %v1230_v18 = vadd.f32 %v2483_v15, %v1229_v0  ;;  %v3817_v0 = vsub.s32 %v1393_v46, %v3811_v48  ;;  %v1372_v15 = vld [vmem:[%s4472_s3 + $0x10] sm:$0xff] }
 0x253   : > { %v2485_v19 = vpop.f32.mrf.mxu0 }
 0x254   : > { %v2486_v21 = vadd.f32 %v2485_v19, %v2484_v16  ;;  %2640 = vmatmul.mubr.msk.f32.gmra.mxu0 %vm814_vm3, %v1230_v18 }
 0x255   : > { %v2487_v22 = vpop.f32.mrf.mxu0  ;;  %2642 = vmatprep.mubr.msk.f32.mxu0 %vm4483_vm2, %v2822_v2 }
 0x256   : > { %v1235_v24 = vadd.f32 %v2486_v21, %v1234_v1  ;;  %v1371_v1 = vld [vmem:[%s4472_s3 + $0x8] sm:$0xff] }
 0x257   : > { %v2488_v28 = vpop.f32.mrf.mxu0 }
 0x258   : > { %v2489_v31 = vadd.f32 %v2488_v28, %v2487_v22  ;;  %2643 = vmatmul.mubr.msk.f32.gmra.mxu0 %vm814_vm3, %v1235_v24 }
 0x259   : > { %v2490_v34 = vpop.f32.mrf.mxu0  ;;  %2645 = vmatprep.mubr.msk.f32.mxu0 %vm4483_vm2, %v2822_v2 }
 0x25a   : > { %v1240_v36 = vadd.f32 %v2489_v31, %v1239_v52  ;;  %v1899_v31 = vld [vmem:[%s4473_s4 + $0x178] sm:$0xff] }
 0x25b   : > { %v2491_v37 = vpop.f32.mrf.mxu0  ;;  %2001 = vmatpush1.msra.mxu1 %v1899_v31 }
 0x25c   : > { %v2492_v39 = vadd.f32 %v2491_v37, %v2490_v34  ;;  %2646 = vmatmul.mubr.msk.f32.gmra.mxu0 %vm814_vm3, %v1240_v36  ;;  %2002 = vmatprep.subr.mxu1 %v2822_v2  ;;  %v1898_v34 = vld [vmem:[%s4473_s4 + $0x170] sm:$0xff] }
 0x25d   : > { %2648 = vmatprep.mubr.msk.f32.mxu0 %vm4483_vm2, %v2822_v2  ;;  %2003 = vmatpush1.msra.mxu1 %v1898_v34  ;;  %vm1478_vm2 = vcmp.lt.s32.totalorder %v1385_v42, 84 }
 0x25e   : > { %v1245_v40 = vadd.f32 %v2492_v39, %v1244_v4  ;;  %2004 = vmatprep.subr.mxu1 %v2822_v2 }
 0x260   : > { %2649 = vmatmul.mubr.msk.f32.gmra.mxu0 %vm814_vm3, %v1245_v40  ;;  %v1897_v40 = vld [vmem:[%s4473_s4 + $0x168] sm:$0xff]  ;;  %vm1456_vm3 = vmand %vm1454_vm12, %vm1455_vm13  ;;  %vm4134_vm12 = vcmp.ge.s32.totalorder %v1385_v42, 84  ;;  %vm4139_vm13 = vcmp.lt.s32.totalorder %v1385_v42, 96 }
 0x261   : > { %2005 = vmatpush1.msra.mxu1 %v1897_v40  ;;  %v1874_v40 = vld [vmem:[%s4473_s4 + $0xb0] sm:$0xff] }
 0x262   : > { %2006 = vmatprep.subr.mxu1 %v2822_v2 }
 0x263   : > { %2007 = vmatpush1.msra.mxu1 %v1896_v43  ;;  %v1858_v43 = vld [vmem:[%s4473_s4 + $0x30] sm:$0xff] }
 0x264   : > { %2008 = vmatprep.subr.mxu1 %v2822_v2 }
 0x310   : > { %v1341_v49 = vpop.f32.mrf.mxu0 }
 0x311   : > { %v1365_v55 = vadd.f32 %v1341_v49, %v1009_v38 }
 0x312   : > { %v2638_v59 = vpop.f32.mrf.mxu0 }
 0x313   : > { %v1375_v60 = vadd.f32 %v1370_v51, %v1365_v55  ;;  %v1373_v55 = vld [vmem:[%s4472_s3 + $0x18] sm:$0xff] }
 0x314   : > { %v1346_v54 = vpop.f32.mrf.mxu0 }
 0x315   : > { %v1380_v52 = vmax.f32 %v1375_v60, 0.0  ;;  %v1366_v30 = vadd.f32 %v1346_v54, %v1014_v47  ;;  %v1895_v60 = vld [vmem:[%s4473_s4 + $0x158] sm:$0xff] }
 0x316   : > { %v2641_v4 = vpop.f32.mrf.mxu0  ;;  %2009 = vmatpush1.msra.mxu1 %v1895_v60  ;;  %v1905_v60 = vld [vmem:[%s4473_s4 + $0x1a8] sm:$0xff] }
 0x317   : > { %v1376_v5 = vadd.f32 %v1371_v1, %v1366_v30  ;;  %v1436_v6 = vcombine.high %v1380_v52, %v1380_v52  ;;  %v1397_v14 = vrot.slane %v1380_v52, %v3817_v0  ;;  %1389 = vst.msk [vmem:[#allocation2] sm:$0x1] %vm3823_vm4, %v1380_v52  ;;  %2010 = vmatprep.subr.mxu1 %v2822_v2  ;;  %v1883_v30 = vld [vmem:[%s4473_s4 + $0xf8] sm:$0xff] }
 0x318   : > { %v1351_v11 = vpop.f32.mrf.mxu0  ;;  %2506 = vmatprep.subr.mxu0 %v1883_v30  ;;  %v1867_v4 = vld [vmem:[%s4473_s4 + $0x78] sm:$0xff] }
 0x319   : > { %v1443_v33 = vrot.slane %v1436_v6, %v3817_v0  ;;  %v1398_v17 = vcombine.high %v1397_v14, %v1397_v14  ;;  %v1381_v23 = vmax.f32 %v1376_v5, 0.0  ;;  %v1405_v25 = vrot.slane %v1397_v14, %v3817_v0  ;;  %v1893_v5 = vld [vmem:[%s4473_s4 + $0x148] sm:$0xff]  ;;  %2507 = vmatpush3.msra.mxu0 %v1867_v4  ;;  %v1882_v6 = vld [vmem:[%s4473_s4 + $0xf0] sm:$0xff]  ;;  %v1855_v30 = vld [vmem:[%s4473_s4 + $0x18] sm:$0xff] }
 0x31a   : > { %v2644_v20 = vpop.f32.mrf.mxu0  ;;  %v1367_v10 = vadd.f32 %v1351_v11, %v3791_v57  ;;  %v1866_v14 = vld [vmem:[%s4473_s4 + $0x70] sm:$0xff]  ;;  %v1892_v11 = vld [vmem:[%s4473_s4 + $0x140] sm:$0xff]  ;;  %2508 = vmatprep.subr.mxu0 %v1882_v6 }
 0x31b   : > { %v1450_v26 = vrot.slane %v1443_v33, %v3817_v0  ;;  %v1412_v32 = vrot.slane %v1398_v17, %v3817_v0  ;;  %v1496_v41 = vrot.slane %v1381_v23, %v3817_v0  ;;  %v1458_v47 = vcombine.high %v1443_v33, %v1443_v33  ;;  %2509 = vmatpush3.msra.mxu0 %v1866_v14  ;;  %v1870_v14 = vld [vmem:[%s4473_s4 + $0x90] sm:$0xff] }
 0x31c   : > { %v3832_v29 = vpop.f32.mrf.mxu0  ;;  %v1420_v58 = vcombine.high %v1405_v25, %v1405_v25  ;;  %v1377_v16 = vadd.f32 %v1372_v15, %v1367_v10  ;;  %v1880_v25 = vld [vmem:[%s4473_s4 + $0xe0] sm:$0xff]  ;;  %v1862_v10 = vld [vmem:[%s4473_s4 + $0x50] sm:$0xff]  ;;  %v1861_v15 = vld [vmem:[%s4473_s4 + $0x48] sm:$0xff] }
 0x31d   : > { %1451 = vrot.lane.b32.xlu1 %v1450_v26, %s2825_s25  ;;  %1413 = vrot.lane.b32.xlu0 %v1412_v32, %s2826_s26  ;;  %v1428_v35 = vcombine.high %v1412_v32, %v1412_v32  ;;  %v1473_v3 = vcombine.high %v1450_v26, %v1450_v26  ;;  %v1503_v8 = vrot.slane %v1496_v41, %v3817_v0  ;;  %s2834_s25 = smov 84   ;;  %v1891_v32 = vld [vmem:[%s4473_s4 + $0x138] sm:$0xff] }
 0x31e   : > { %v2647_v38 = vpop.f32.mrf.mxu0  ;;  %v1465_v50 = vrot.slane %v1458_v47, %v3817_v0  ;;  %v1511_v13 = vcombine.high %v1496_v41, %v1496_v41  ;;  %v1382_v21 = vmax.f32 %v1377_v16, 0.0  ;;  %v1368_v46 = vadd.f32 %v3832_v29, %v3793_v62  ;;  %v1894_v62 = vld [vmem:[%s4473_s4 + $0x150] sm:$0xff]  ;;  %v1865_v29 = vld [vmem:[%s4473_s4 + $0x68] sm:$0xff] }
 0x31f   : > { %v1526_v12 = vcombine.high %v1503_v8, %v1503_v8  ;;  %2011 = vmatpush1.msra.mxu1 %v1894_v62  ;;  %v1864_v38 = vld [vmem:[%s4473_s4 + $0x60] sm:$0xff]  ;;  %v1890_v47 = vld [vmem:[%s4473_s4 + $0x130] sm:$0xff] }
 0x320   : > { %v1361_v53 = vpop.f32.mrf.mxu0  ;;  %v1518_v18 = vrot.slane %v1511_v13, %v3817_v0  ;;  %v1481_v19 = vcombine.high %v1465_v50, %v1465_v50  ;;  %v1605_v36 = vrot.slane %v1382_v21, %v3817_v0  ;;  %v1651_v45 = vcombine.high %v1382_v21, %v1382_v21  ;;  %2012 = vmatprep.subr.mxu1 %v2822_v2  ;;  %v1877_v13 = vld [vmem:[%s4473_s4 + $0xc8] sm:$0xff] }
 0x321   : > { %v1369_v61 = vadd.f32 %v1361_v53, %v3795_v44  ;;  %1429 = vrot.lane.b32.xlu1 %v1428_v35, %s2827_s13  ;;  %1421 = vrot.lane.b32.xlu0 %v1420_v58, %s2828_s17  ;;  %v1545_v44 = vcombine.high %v1381_v23, %v1381_v23  ;;  %v1378_v54 = vadd.f32 %v1373_v55, %v1368_v46  ;;  %v1881_v23 = vld [vmem:[%s4473_s4 + $0xe8] sm:$0xff]  ;;  %v1863_v58 = vld [vmem:[%s4473_s4 + $0x58] sm:$0xff] }
 0x322   : > { %v2650_v27 = vpop.f32.mrf.mxu0  ;;  %v1537_v24 = vcombine.high %v1518_v18, %v1518_v18  ;;  %v1612_v49 = vrot.slane %v1605_v36, %v3817_v0  ;;  %v1620_v51 = vcombine.high %v1605_v36, %v1605_v36  ;;  %v1658_v52 = vrot.slane %v1651_v45, %v3817_v0  ;;  %2013 = vmatpush1.msra.mxu1 %v1893_v5  ;;  %v1873_v55 = vld [vmem:[%s4473_s4 + $0xa8] sm:$0xff]  ;;  %v1903_v5 = vld [vmem:[%s4473_s4 + $0x198] sm:$0xff] }
 0x323   : > { %v3844_v7 = vadd.f32 %v1374_v56, %v1369_v61  ;;  %v1552_v57 = vrot.slane %v1545_v44, %v3817_v0  ;;  %v1383_v33 = vmax.f32 %v1378_v54, 0.0  ;;  %2014 = vmatprep.subr.mxu1 %v2822_v2  ;;  %2510 = vmatprep.subr.mxu0 %v1881_v23  ;;  %v1879_v56 = vld [vmem:[%s4473_s4 + $0xd8] sm:$0xff]  ;;  %v1889_v61 = vld [vmem:[%s4473_s4 + $0x128] sm:$0xff]  ;;  %v1878_v27 = vld [vmem:[%s4473_s4 + $0xd0] sm:$0xff] }
 0x324   : > { %v1627_v1 = vrot.slane %v1620_v51, %v3817_v0  ;;  %v1635_v63 = vcombine.high %v1612_v49, %v1612_v49  ;;  %v1665_v17 = vrot.slane %v1658_v52, %v3817_v0  ;;  %v1673_v26 = vcombine.high %v1658_v52, %v1658_v52  ;;  %2015 = vmatpush1.msra.mxu1 %v1892_v11  ;;  %v1871_v52 = vld [vmem:[%s4473_s4 + $0x98] sm:$0xff]  ;;  %v1854_v11 = vld [vmem:[%s4473_s4 + $0x10] sm:$0xff]  ;;  %v1901_v23 = vld [vmem:[%s4473_s4 + $0x188] sm:$0xff] }
 0x325   : > { %v1384_v9 = vmax.f32 %v3844_v7, 0.0  ;;  %1474 = vrot.lane.b32.xlu1 %v1473_v3, %s2829_s18  ;;  %1466 = vrot.lane.b32.xlu0 %v1465_v50, %s2830_s19  ;;  %v1559_v22 = vrot.slane %v1552_v57, %v3817_v0  ;;  %v1567_v28 = vcombine.high %v1552_v57, %v1552_v57  ;;  %s2835_s18 = smov 16   ;;  %s2836_s19 = smov 4   ;;  %v1714_v41 = vrot.slane %v1383_v33, %v3817_v0  ;;  %v1860_v7 = vld [vmem:[%s4473_s4 + $0x40] sm:$0xff] }
 0x326   : > { %v1643_v20 = vcombine.high %v1627_v1, %v1627_v1  ;;  %2016 = vmatprep.subr.mxu1 %v2822_v2  ;;  %v1691_v35 = vcombine.high %v1665_v17, %v1665_v17  ;;  %2511 = vmatpush3.msra.mxu0 %v1865_v29  ;;  %v1680_v53 = vrot.slane %v1673_v26, %v3817_v0  ;;  %v1868_v26 = vld [vmem:[%s4473_s4 + $0x80] sm:$0xff] }
 0x327   : > { %1813 = vst.msk [vmem:[#allocation2 + $0x3] sm:$0x1] %vm3823_vm4, %v1384_v9  ;;  %v1582_v37 = vcombine.high %v1559_v22, %v1559_v22  ;;  %v1574_v39 = vrot.slane %v1567_v28, %v3817_v0  ;;  %2017 = vmatpush1.msra.mxu1 %v1891_v32  ;;  %2512 = vmatprep.subr.mxu0 %v1880_v25  ;;  %v1852_v29 = vld [vmem:[%s4473_s4] sm:$0xff]  ;;  %vm1477_vm4 = vcmp.ge.s32.totalorder %v1385_v42, 72 }
 0x328   : > { %2018 = vmatprep.subr.mxu1 %v2822_v2  ;;  %2513 = vmatpush3.msra.mxu0 %v1864_v38  ;;  %v1760_v3 = vcombine.high %v1383_v33, %v1383_v33  ;;  %v1699_v50 = vcombine.high %v1680_v53, %v1680_v53  ;;  %v1729_v44 = vcombine.high %v1714_v41, %v1714_v41  ;;  %v1902_v33 = vld [vmem:[%s4473_s4 + $0x190] sm:$0xff]  ;;  %v1900_v32 = vld [vmem:[%s4473_s4 + $0x180] sm:$0xff]  ;;  %v4507_v38 = vmov 0 }
 0x329   : > { %1527 = vrot.lane.b32.xlu1 %v1526_v12, %s2831_s22  ;;  %1504 = vrot.lane.b32.xlu0 %v1503_v8, %s2832_s23  ;;  %v1590_v59 = vcombine.high %v1574_v39, %v1574_v39  ;;  %s2839_s22 = smov 64   ;;  %s2840_s23 = smov 52   ;;  %v1721_v8 = vrot.slane %v1714_v41, %v3817_v0  ;;  %v1888_v12 = vld [vmem:[%s4473_s4 + $0x120] sm:$0xff]  ;;  %v1821_v16 = vrot.slane %v1384_v9, %v3817_v0  ;;  %v1886_v9 = vld [vmem:[%s4473_s4 + $0x110] sm:$0xff]  ;;  %v4508_v38 = vsel %vm4076_vm6, 4294967295, %v4507_v38  ;;  %vm1479_vm6 = vmand %vm1477_vm4, %vm1478_vm2 }
 0x32a   : > { %2019 = vmatpush1.msra.mxu1 %v1890_v47  ;;  %2514 = vmatprep.subr.mxu0 %v1879_v56  ;;  %v1767_v57 = vrot.slane %v1760_v3, %v3817_v0  ;;  %v1736_v21 = vrot.slane %v1729_v44, %v3817_v0  ;;  %v4511_v47 = vmov 0  ;;  %v4513_v56 = vmov 0 }
 0x32b   : > { %2020 = vmatprep.subr.mxu1 %v2822_v2  ;;  %2515 = vmatpush3.msra.mxu0 %v1863_v58  ;;  %v1822_v31 = vcombine.high %v1821_v16, %v1821_v16  ;;  %v1829_v46 = vrot.slane %v1821_v16, %v3817_v0  ;;  %v4512_v47 = vsel %vm4090_vm9, 4294967295, %v4511_v47  ;;  %v4514_v56 = vsel %vm4095_vm10, 4294967295, %v4513_v56 }
 0x32c   : > { %2021 = vmatpush1.msra.mxu1 %v1889_v61  ;;  %2516 = vmatprep.subr.mxu0 %v1878_v27  ;;  %v1774_v28 = vrot.slane %v1767_v57, %v3817_v0  ;;  %v1752_v34 = vcombine.high %v1736_v21, %v1736_v21  ;;  %v1782_v36 = vcombine.high %v1767_v57, %v1767_v57  ;;  %v4515_v58 = vmov 0  ;;  %v2082_v57 = vld [vmem:[%s4475_s6 + $0x58] sm:$0xff] }
 0x32d   : > { %1519 = vrot.lane.b32.xlu1 %v1518_v18, %s2833_s24  ;;  %1482 = vrot.lane.b32.xlu0 %v1481_v19, %s2834_s25  ;;  %s2837_s24 = smov 40   ;;  %s2842_s25 = smov 76   ;;  %v1744_v18 = vcombine.high %v1721_v8, %v1721_v8  ;;  %v1887_v19 = vld [vmem:[%s4473_s4 + $0x118] sm:$0xff]  ;;  %v1836_v45 = vrot.slane %v1822_v31, %v3817_v0  ;;  %v1841_v62 = vcombine.high %v1829_v46, %v1829_v46  ;;  %v4516_v58 = vsel %vm4100_vm11, 4294967295, %v4515_v58 }
 0x32e   : > { %2022 = vmatprep.subr.mxu1 %v2822_v2  ;;  %2517 = vmatpush3.msra.mxu0 %v1862_v10  ;;  %v1789_v51 = vrot.slane %v1782_v36, %v3817_v0  ;;  %v1872_v0 = vld [vmem:[%s4473_s4 + $0xa0] sm:$0xff]  ;;  %v1797_v54 = vcombine.high %v1774_v28, %v1774_v28  ;;  %vm4149_vm2 = vcmp.lt.s32.totalorder %v1385_v42, 108  ;;  %vm4173_vm4 = vcmp.lt.s32.totalorder %v1385_v42, 132  ;;  %v2074_v31 = vld [vmem:[%s4475_s6 + $0x18] sm:$0xff] }
 0x32f   : > { %2023 = vmatpush1.msra.mxu1 %v1888_v12  ;;  %2518 = vmatprep.subr.mxu0 %v1877_v13  ;;  %v1846_v4 = vcombine.high %v1836_v45, %v1836_v45  ;;  %v1922_v44 = vsub.s32 3, %v3811_v48 }
 0x330   : > { %2024 = vmatprep.subr.mxu1 %v2822_v2  ;;  %2519 = vmatpush3.msra.mxu0 %v1861_v15  ;;  %v1805_v6 = vcombine.high %v1789_v51, %v1789_v51 }
 0x331   : > { %1560 = vrot.lane.b32.xlu1 %v1559_v22, %s2835_s18  ;;  %1538 = vrot.lane.b32.xlu0 %v1537_v24, %s2836_s19  ;;  %s2844_s19 = smov 112   ;;  %s2847_s18 = smov 32   ;;  %v1876_v22 = vld [vmem:[%s4473_s4 + $0xc0] sm:$0xff]  ;;  %v1875_v24 = vld [vmem:[%s4473_s4 + $0xb8] sm:$0xff] }
 0x332   : > { %2025 = vmatpush1.msra.mxu1 %v1887_v19  ;;  %2520 = vmatprep.subr.mxu0 %v1876_v22  ;;  %v2081_v19 = vld [vmem:[%s4475_s6 + $0x50] sm:$0xff] }
 0x333   : > { %2026 = vmatprep.subr.mxu1 %v2822_v2  ;;  %2521 = vmatpush3.msra.mxu0 %v1860_v7  ;;  %v2078_v7 = vld [vmem:[%s4475_s6 + $0x38] sm:$0xff] }
 0x334   : > { %2027 = vmatpush1.msra.mxu1 %v1886_v9  ;;  %2522 = vmatprep.subr.mxu0 %v1875_v24  ;;  %v2077_v9 = vld [vmem:[%s4475_s6 + $0x30] sm:$0xff] }
 0x335   : > { %1583 = vrot.lane.b32.xlu1 %v1582_v37, %s2837_s24  ;;  %1575 = vrot.lane.b32.xlu0 %v1574_v39, %s2838_s12  ;;  %v1859_v37 = vld [vmem:[%s4473_s4 + $0x38] sm:$0xff]  ;;  %v1885_v39 = vld [vmem:[%s4473_s4 + $0x108] sm:$0xff]  ;;  %s2853_s24 = smov 92  }
 0x336   : > { %2028 = vmatprep.subr.mxu1 %v2822_v2  ;;  %2523 = vmatpush3.msra.mxu0 %v1859_v37  ;;  %v2071_v37 = vld [vmem:[%s4475_s6] sm:$0xff] }
 0x337   : > { %2029 = vmatpush1.msra.mxu1 %v1885_v39  ;;  %2524 = vmatprep.subr.mxu0 %v1874_v40 }
 0x338   : > { %2030 = vmatprep.subr.mxu1 %v2822_v2  ;;  %2525 = vmatpush3.msra.mxu0 %v1858_v43 }
 0x339   : > { %1613 = vrot.lane.b32.xlu1 %v1612_v49, %s2839_s22  ;;  %1591 = vrot.lane.b32.xlu0 %v1590_v59, %s2840_s23  ;;  %s2841_s22 = smov 88   ;;  %s2850_s23 = smov 44   ;;  %v1884_v49 = vld [vmem:[%s4473_s4 + $0x100] sm:$0xff]  ;;  %v1857_v59 = vld [vmem:[%s4473_s4 + $0x28] sm:$0xff] }
 0x33a   : > { %2031 = vmatpush1.msra.mxu1 %v1884_v49  ;;  %2526 = vmatprep.subr.mxu0 %v1873_v55 }
 0x33b   : > { %2052 = vmatprep.subr.mxu1 %v2822_v2  ;;  %2527 = vmatpush3.msra.mxu0 %v1857_v59 }
 0x33c   : > { %2053 = vmatpush2.msra.mxu1 %v1905_v60  ;;  %2528 = vmatprep.subr.mxu0 %v1872_v0 }
 0x33d   : > { %1636 = vrot.lane.b32.xlu1 %v1635_v63, %s2841_s22  ;;  %1628 = vrot.lane.b32.xlu0 %v1627_v1, %s2842_s25  ;;  %v1856_v1 = vld [vmem:[%s4473_s4 + $0x20] sm:$0xff]  ;;  %s2854_s22 = smov 104  }
 0x33e   : > { %v1904_v63 = vld [vmem:[%s4473_s4 + $0x1a0] sm:$0xff]  ;;  %2054 = vmatprep.subr.mxu1 %v2822_v2  ;;  %2529 = vmatpush3.msra.mxu0 %v1856_v1 }
 0x33f   : > { %2055 = vmatpush2.msra.mxu1 %v1904_v63  ;;  %2530 = vmatprep.subr.mxu0 %v1871_v52 }
 0x340   : > { %2056 = vmatprep.subr.mxu1 %v2822_v2  ;;  %2531 = vmatpush3.msra.mxu0 %v1855_v30 }
 0x341   : > { %1644 = vrot.lane.b32.xlu1 %v1643_v20, %s2843_s10  ;;  %1666 = vrot.lane.b32.xlu0 %v1665_v17, %s2844_s19  ;;  %s2845_s10 = smov 8   ;;  %v1869_v17 = vld [vmem:[%s4473_s4 + $0x88] sm:$0xff]  ;;  %s2323_s19 = sshll.u32 %s2923_s9, 4 }
 0x342   : > { %2057 = vmatpush2.msra.mxu1 %v1903_v5  ;;  %2532 = vmatprep.subr.mxu0 %v1870_v14  ;;  %v1853_v20 = vld [vmem:[%s4473_s4 + $0x8] sm:$0xff]  ;;  %s2856_s9 = smov [#allocation3]  }
 0x343   : > { %2058 = vmatprep.subr.mxu1 %v2822_v2  ;;  %2533 = vmatpush3.msra.mxu0 %v1854_v11 }
 0x344   : > { %2059 = vmatpush2.msra.mxu1 %v1902_v33  ;;  %2534 = vmatprep.subr.mxu0 %v1869_v17 }
 0x345   : > { %1692 = vrot.lane.b32.xlu1 %v1691_v35, %s2845_s10  ;;  %1681 = vrot.lane.b32.xlu0 %v1680_v53, %s2846_s21  ;;  %s2848_s21 = smov 20   ;;  %v1910_v35 = vsub.s32 0, %v3811_v48  ;;  %s2764_s10 = sshll.u32 %s2856_s9, 4  ;;  %s2765_s10 = int_to_ptr.vmem [resolvable:$false] %s2764_s10 }
 0x346   : > { %2060 = vmatprep.subr.mxu1 %v2822_v2  ;;  %2535 = vmatpush3.msra.mxu0 %v1853_v20 }
 0x347   : > { %2061 = vmatpush2.msra.mxu1 %v1901_v23  ;;  %2536 = vmatprep.subr.mxu0 %v1868_v26 }
 0x348   : > { %2062 = vmatprep.subr.mxu1 %v2822_v2  ;;  %2537 = vmatpush3.msra.mxu0 %v1852_v29 }
 0x349   : > { %1722 = vrot.lane.b32.xlu1 %v1721_v8, %s2847_s18  ;;  %1700 = vrot.lane.b32.xlu0 %v1699_v50, %s2848_s21  ;;  %s2849_s18 = smov 56   ;;  %s2855_s21 = smov 116  }
 0x34a   : > { %2063 = vmatpush2.msra.mxu1 %v1900_v32  ;;  %2651 = vmatprep.subr.mxu0 %v2822_v2 }
 0x34d   : > { %1745 = vrot.lane.b32.xlu1 %v1744_v18, %s2849_s18  ;;  %1737 = vrot.lane.b32.xlu0 %v1736_v21, %s2850_s23  ;;  %s2852_s23 = smov 68   ;;  %v2083_v18 = vld [vmem:[%s4475_s6 + $0x60] sm:$0xff] }
 0x351   : > { %1775 = vrot.lane.b32.xlu1 %v1774_v28, %s2851_s20  ;;  %1753 = vrot.lane.b32.xlu0 %v1752_v34, %s2852_s23  ;;  %v2075_v28 = vld [vmem:[%s4475_s6 + $0x20] sm:$0xff] }
 0x355   : > { %1837 = vrot.lane.b32.xlu1 %v1836_v45, %s2826_s26  ;;  %1790 = vrot.lane.b32.xlu0 %v1789_v51, %s2853_s24  ;;  %s296_s26 = sand.u32 1, %s2812_s28  }
 0x356   : > { %s297_s20 = scalar_lea.vmem [#allocation3], %s296_s26  ;;  %s2161_s24 = scalar_lea.sflag [#allocation4], %s296_s26 }
 0x359   : > { %1842 = vrot.lane.b32.xlu1 %v1841_v62, %s2828_s17  ;;  %1798 = vrot.lane.b32.xlu0 %v1797_v54, %s2854_s22  ;;  %s2766_s17 = scalar_lea.vmem %s2765_s10, 32 }
 0x35d   : > { %1847 = vrot.lane.b32.xlu1 %v1846_v4, %s2827_s13  ;;  %1806 = vrot.lane.b32.xlu0 %v1805_v6, %s2855_s21  ;;  %s2173_s21 = sshll.u32 %s297_s20, 4  ;;  %s4434_s13 = scalar_lea.hbm %s4477_s8, %s2323_s19  ;;  %s2174_s21 = int_to_ptr.vmem [resolvable:$true] %s2173_s21 }
 0x35e   : > { %s2760_s25 = scalar_lea.vmem %s2174_s21, 16  ;;  %p2767_p0 = scmp.lt.s32.totalorder %s2174_s21, %s2765_s10 }
 0x35f   : > { %p2761_p11 = scmp.ne.s32.totalorder %s2174_s21, %s2760_s25  ;;  %p2768_p1 = scmp.lt.s32.totalorder %s2766_s17, %s2760_s25 }
 0x361   : > { %p2762_p12 = pnand %p2761_p11, %p2940_p5  ;;  %p2769_p2 = por %p2768_p1, %p2767_p0 }
 0x363   : > { %p2763_p13 = pneg %p2762_p12 }
 0x365   : > { %p2770_p3 = pnand %p2769_p2, %p2763_p13 }
 0x38f   : > { %v1452_v41 = vpop.permute.xlu1 %1451  ;;  %v1414_v53 = vpop.permute.xlu0 %1413 }
 0x390   : > { %1419 = vst.msk [vmem:[#allocation2] sm:$0x1] %vm4484_vm7, %v1414_v53  ;;  %vm1471_vm7 = vmand %vm1469_vm0, %vm1470_vm1  ;;  %vm4144_vm0 = vcmp.ge.s32.totalorder %v1385_v42, 96 }
 0x391   : > { %vm1487_vm1 = vmand %vm4134_vm12, %vm4139_vm13  ;;  %vm4187_vm12 = vcmp.lt.s32.totalorder %v1385_v42, 16  ;;  %vm1530_vm13 = vcmask 982016  }
 0x393   : > { %v1430_v61 = vpop.permute.xlu1 %1429  ;;  %v1422_v27 = vpop.permute.xlu0 %1421 }
 0x394   : > { %1427 = vst.msk [vmem:[#allocation2] sm:$0x1] %vm4487_vm14, %v1422_v27  ;;  %vm4182_vm14 = vcmp.ge.s32.totalorder %v1385_v42, 4 }
 0x395   : > { %1435 = vst.msk [vmem:[#allocation2] sm:$0x1] %vm4486_vm15, %v1430_v61  ;;  %vm1509_vm15 = vmand %vm4144_vm0, %vm4149_vm2  ;;  %vm4196_vm0 = vcmp.ge.s32.totalorder %v1385_v42, 16  ;;  %vm4201_vm2 = vcmp.lt.s32.totalorder %v1385_v42, 28 }
 0x396   : > { %1457 = vst.msk [vmem:[#allocation2] sm:$0x1] %vm1456_vm3, %v1452_v41  ;;  %vm4168_vm3 = vcmp.ge.s32.totalorder %v1385_v42, 120 }
 0x397   : > { %v1475_v3 = vpop.permute.xlu1 %1474  ;;  %v1467_v8 = vpop.permute.xlu0 %1466  ;;  %vm1535_vm10 = vmand %vm4168_vm3, %vm4173_vm4 }
 0x398   : > { %1472 = vst.msk [vmem:[#allocation2] sm:$0x1] %vm1471_vm7, %v1467_v8  ;;  %vm4159_vm7 = vcmp.lt.s32.totalorder %v1385_v42, 120 }
 0x399   : > { %1480 = vst.msk [vmem:[#allocation2] sm:$0x1] %vm1479_vm6, %v1475_v3  ;;  %vm4154_vm6 = vcmp.ge.s32.totalorder %v1385_v42, 108 }
 0x39a   : > { %vm1524_vm11 = vmand %vm4154_vm6, %vm4159_vm7 }
 0x39b   : > { %v1528_v50 = vpop.permute.xlu1 %1527  ;;  %v1505_v12 = vpop.permute.xlu0 %1504  ;;  %vm1543_vm6 = vmand %vm4182_vm14, %vm4187_vm12  ;;  %vm1587_vm14 = vcmp.lt.s32.totalorder %v1385_v42, 52  ;;  %vm4234_vm12 = vcmp.ge.s32.totalorder %v1385_v42, 52 }
 0x39c   : > { %v1529_v21 = vrot.slane %v1528_v50, 7  ;;  %vm1565_vm7 = vmand %vm4196_vm0, %vm4201_vm2  ;;  %vm1617_vm0 = vcmp.lt.s32.totalorder %v1385_v42, 76 }
 0x39e   : > { %v1531_v34 = vsel %vm1530_vm13, %v1529_v21, %v1528_v50  ;;  %vm1616_vm13 = vcmp.ge.s32.totalorder %v1385_v42, 64  ;;  %v2080_v21 = vld [vmem:[%s4475_s6 + $0x48] sm:$0xff] }
 0x39f   : > { %v1520_v22 = vpop.permute.xlu1 %1519  ;;  %v1483_v24 = vpop.permute.xlu0 %1482 }
 0x3a0   : > { %1488 = vst.msk [vmem:[#allocation2] sm:$0x1] %vm1487_vm1, %v1483_v24  ;;  %vm4218_vm1 = vcmp.ge.s32.totalorder %v1385_v42, 28  ;;  %v2076_v24 = vld [vmem:[%s4475_s6 + $0x28] sm:$0xff] }
 0x3a1   : > { %1510 = vst.msk [vmem:[#allocation2] sm:$0x1] %vm1509_vm15, %v1505_v12  ;;  %vm4223_vm15 = vcmp.lt.s32.totalorder %v1385_v42, 40 }
 0x3a2   : > { %1525 = vst.msk [vmem:[#allocation2] sm:$0x1] %vm1524_vm11, %v1520_v22  ;;  %vm1586_vm11 = vcmp.ge.s32.totalorder %v1385_v42, 40  ;;  %vm1580_vm3 = vmand %vm4218_vm1, %vm4223_vm15  ;;  %vm1632_vm1 = vcmp.lt.s32.totalorder %v1385_v42, 88  ;;  %vm1639_vm15 = vcmp.ge.s32.totalorder %v1385_v42, 88  ;;  %v2079_v22 = vld [vmem:[%s4475_s6 + $0x40] sm:$0xff] }
 0x3a3   : > { %v1561_v36 = vpop.permute.xlu1 %1560  ;;  %v1539_v40 = vpop.permute.xlu0 %1538  ;;  %1536 = vst.msk [vmem:[#allocation2] sm:$0x3] %vm1535_vm10, %v1531_v34  ;;  %vm1588_vm4 = vmand %vm1586_vm11, %vm1587_vm14  ;;  %vm1595_vm10 = vcmp.lt.s32.totalorder %v1385_v42, 64  ;;  %vm1640_vm11 = vcmp.lt.s32.totalorder %v1385_v42, 100  ;;  %v2073_v34 = vld [vmem:[%s4475_s6 + $0x10] sm:$0xff] }
 0x3a4   : > { %1544 = vst.msk [vmem:[#allocation2 + $0x1] sm:$0x1] %vm1543_vm6, %v1539_v40  ;;  %vm1596_vm2 = vmand %vm4234_vm12, %vm1595_vm10  ;;  %vm1669_vm10 = vcmp.ge.s32.totalorder %v1385_v42, 112 }
 0x3a5   : > { %1566 = vst.msk [vmem:[#allocation2 + $0x1] sm:$0x1] %vm1565_vm7, %v1561_v36  ;;  %vm1618_vm6 = vmand %vm1616_vm13, %vm1617_vm0  ;;  %vm4244_vm7 = vcmp.ge.s32.totalorder %v1385_v42, 76  ;;  %vm1670_vm13 = vcmp.lt.s32.totalorder %v1385_v42, 124  ;;  %v2072_v36 = vld [vmem:[%s4475_s6 + $0x8] sm:$0xff] }
 0x3a6   : > { %vm1633_vm14 = vmand %vm4244_vm7, %vm1632_vm1  ;;  %vm4268_vm7 = vcmp.ge.s32.totalorder %v1385_v42, 8  ;;  %vm4273_vm1 = vcmp.lt.s32.totalorder %v1385_v42, 20 }
 0x3a7   : > { %v1584_v43 = vpop.permute.xlu1 %1583  ;;  %v1576_v46 = vpop.permute.xlu0 %1575  ;;  %vm1641_vm12 = vmand %vm1639_vm15, %vm1640_vm11  ;;  %vm4278_vm15 = vcmp.ge.s32.totalorder %v1385_v42, 20  ;;  %vm4283_vm11 = vcmp.lt.s32.totalorder %v1385_v42, 32 }
 0x3a8   : > { %1581 = vst.msk [vmem:[#allocation2 + $0x1] sm:$0x1] %vm1580_vm3, %v1576_v46  ;;  %vm1647_vm3 = vcmp.ge.s32.totalorder %v1385_v42, 100  ;;  %vm1671_vm9 = vmand %vm1669_vm10, %vm1670_vm13  ;;  %vm4310_vm13 = vcmp.ge.s32.totalorder %v1385_v42, 44 }
 0x3a9   : > { %1589 = vst.msk [vmem:[#allocation2 + $0x1] sm:$0x1] %vm1588_vm4, %v1584_v43  ;;  %vm1648_vm4 = vcmp.lt.s32.totalorder %v1385_v42, 112  ;;  %vm1705_vm10 = vmand %vm4278_vm15, %vm4283_vm11  ;;  %vm1756_vm15 = vcmp.ge.s32.totalorder %v1385_v42, 68  ;;  %vm1757_vm11 = vcmp.lt.s32.totalorder %v1385_v42, 80 }
 0x3aa   : > { %vm1649_vm0 = vmand %vm1647_vm3, %vm1648_vm4  ;;  %vm4292_vm3 = vcmp.ge.s32.totalorder %v1385_v42, 32  ;;  %vm4297_vm4 = vcmp.lt.s32.totalorder %v1385_v42, 44  ;;  %v1906_v43 = vld [vmem:[%s4474_s5] sm:$0x1] }
 0x3ab   : > { %v1614_v49 = vpop.permute.xlu1 %1613  ;;  %v1592_v55 = vpop.permute.xlu0 %1591 }
 0x3ac   : > { %1597 = vst.msk [vmem:[#allocation2 + $0x1] sm:$0x1] %vm1596_vm2, %v1592_v55  ;;  %vm4258_vm2 = vcmp.ge.s32.totalorder %v1385_v42, 124 }
 0x3ad   : > { %1619 = vst.msk [vmem:[#allocation2 + $0x1] sm:$0x1] %vm1618_vm6, %v1614_v49  ;;  %vm4263_vm6 = vcmp.lt.s32.totalorder %v1385_v42, 136 }
 0x3af   : > { %v1637_v59 = vpop.permute.xlu1 %1636  ;;  %v1629_v60 = vpop.permute.xlu0 %1628 }
 0x3b0   : > { %1634 = vst.msk [vmem:[#allocation2 + $0x1] sm:$0x1] %vm1633_vm14, %v1629_v60  ;;  %vm1689_vm14 = vmand %vm4258_vm2, %vm4263_vm6  ;;  %vm1748_vm6 = vcmp.ge.s32.totalorder %v1385_v42, 56 }
 0x3b1   : > { %1642 = vst.msk [vmem:[#allocation2 + $0x1] sm:$0x1] %vm1641_vm12, %v1637_v59  ;;  %vm1697_vm12 = vmand %vm4268_vm7, %vm4273_vm1  ;;  %vm1749_vm7 = vcmp.lt.s32.totalorder %v1385_v42, 68 }
 0x3b2   : > { %vm1727_vm2 = vmand %vm4292_vm3, %vm4297_vm4  ;;  %vm1779_vm3 = vcmp.lt.s32.totalorder %v1385_v42, 92 }
 0x3b3   : > { %v1645_v0 = vpop.permute.xlu1 %1644  ;;  %v1667_v62 = vpop.permute.xlu0 %1666  ;;  %vm1758_vm4 = vmand %vm1756_vm15, %vm1757_vm11  ;;  %vm1809_vm15 = vcmp.ge.s32.totalorder %v1385_v42, 116  ;;  %vm1810_vm11 = vcmp.lt.s32.totalorder %v1385_v42, 128 }
 0x3b4   : > { %1650 = vst.msk [vmem:[#allocation2 + $0x1] sm:$0x1] %vm1649_vm0, %v1645_v0  ;;  %vm4315_vm0 = vcmp.lt.s32.totalorder %v1385_v42, 56 }
 0x3b5   : > { %1672 = vst.msk [vmem:[#allocation2 + $0x1] sm:$0x1] %vm1671_vm9, %v1667_v62  ;;  %vm1684_vm9 = vcmask 1014784   ;;  %vm1742_vm1 = vmand %vm4310_vm13, %vm4315_vm0  ;;  %vm1794_vm13 = vcmp.lt.s32.totalorder %v1385_v42, 104 }
 0x3b7   : > { %v1693_v30 = vpop.permute.xlu1 %1692  ;;  %v1682_v4 = vpop.permute.xlu0 %1681 }
 0x3b8   : > { %v1683_v14 = vrot.slane %v1682_v4, 7 }
 0x3ba   : > { %v1685_v17 = vsel %vm1684_vm9, %v1683_v14, %v1682_v4  ;;  %vm1750_vm9 = vmand %vm1748_vm6, %vm1749_vm7  ;;  %vm1802_vm6 = vcmp.lt.s32.totalorder %v1385_v42, 116  ;;  %vm4569_vm7 = vnez %v4508_v38 }
 0x3bb   : > { %v1723_v20 = vpop.permute.xlu1 %1722  ;;  %1690 = vst.msk [vmem:[#allocation2 + $0x1] sm:$0x3] %vm1689_vm14, %v1685_v17  ;;  %v1701_v29 = vpop.permute.xlu0 %1700  ;;  %vm1778_vm14 = vcmp.ge.s32.totalorder %v1385_v42, 80 }
 0x3bc   : > { %1698 = vst.msk [vmem:[#allocation2 + $0x2] sm:$0x1] %vm1697_vm12, %v1693_v30  ;;  %vm1780_vm12 = vmand %vm1778_vm14, %vm1779_vm3  ;;  %vm4571_vm14 = vnez %v4512_v47  ;;  %v1918_v47 = vsub.s32 2, %v3811_v48 }
 0x3bd   : > { %1706 = vst.msk [vmem:[#allocation2 + $0x2] sm:$0x1] %vm1705_vm10, %v1701_v29  ;;  %vm1793_vm10 = vcmp.ge.s32.totalorder %v1385_v42, 92  ;;  %vm4572_vm3 = vmand %vm4085_vm8, %vm4571_vm14  ;;  %vm1927_vm8 = vcmask 392192  }
 0x3be   : > { %1728 = vst.msk [vmem:[#allocation2 + $0x2] sm:$0x1] %vm1727_vm2, %v1723_v20  ;;  %vm1795_vm0 = vmand %vm1793_vm10, %vm1794_vm13  ;;  %vm1801_vm2 = vcmp.ge.s32.totalorder %v1385_v42, 104  ;;  %v1914_v42 = vsub.s32 1, %v3811_v48  ;;  %vm4576_vm13 = vmmov 0   ;;  %v2084_v48 = vld [vmem:[%s4475_s6 + $0x68] sm:$0xff] }
 0x3bf   : > { %v1746_v32 = vpop.permute.xlu1 %1745  ;;  %v1738_v41 = vpop.permute.xlu0 %1737 }
 0x3c0   : > { %1743 = vst.msk [vmem:[#allocation2 + $0x2] sm:$0x1] %vm1742_vm1, %v1738_v41  ;;  %vm4570_vm1 = vmand %vm4071_vm5, %vm4569_vm7  ;;  %vm4573_vm5 = vnez %v4514_v56  ;;  %v2086_v56 = vld [vmem:[%s4475_s6 + $0x78] sm:$0xff] }
 0x3c1   : > { %1751 = vst.msk [vmem:[#allocation2 + $0x2] sm:$0x1] %vm1750_vm9, %v1746_v32  ;;  %vm1803_vm9 = vmand %vm1801_vm2, %vm1802_vm6 }
 0x3c3   : > { %v1776_v53 = vpop.permute.xlu1 %1775  ;;  %v1754_v61 = vpop.permute.xlu0 %1753 }
 0x3c4   : > { %1759 = vst.msk [vmem:[#allocation2 + $0x2] sm:$0x1] %vm1758_vm4, %v1754_v61  ;;  %vm1811_vm4 = vmand %vm1809_vm15, %vm1810_vm11 }
 0x3c5   : > { %1781 = vst.msk [vmem:[#allocation2 + $0x2] sm:$0x1] %vm1780_vm12, %v1776_v53  ;;  %vm4574_vm12 = vnez %v4516_v58  ;;  %v2085_v58 = vld [vmem:[%s4475_s6 + $0x70] sm:$0xff] }
 0x3c6   : > { %vm4575_vm10 = vmand %vm4573_vm5, %vm4574_vm12 }
 0x3c7   : > { %v1838_v27 = vpop.permute.xlu1 %1837  ;;  %v1791_v3 = vpop.permute.xlu0 %1790 }
 0x3c8   : > { %1840 = vst.msk [vmem:[#allocation2 + $0x3] sm:$0x1] %vm4570_vm1, %v1838_v27 }
 0x3c9   : > { %1796 = vst.msk [vmem:[#allocation2 + $0x2] sm:$0x1] %vm1795_vm0, %v1791_v3  ;;  %vm2158_vm0 = vcmask 16384  }
 0x3cb   : > { %v1843_v8 = vpop.permute.xlu1 %1842  ;;  %v1799_v50 = vpop.permute.xlu0 %1798 }
 0x3cc   : > { %1845 = vst.msk [vmem:[#allocation2 + $0x3] sm:$0x1] %vm4572_vm3, %v1843_v8 }
 0x3cd   : > { %1804 = vst.msk [vmem:[#allocation2 + $0x2] sm:$0x1] %vm1803_vm9, %v1799_v50 }
 0x3cf   : > { %v1848_v25 = vpop.permute.xlu1 %1847  ;;  %v1807_v38 = vpop.permute.xlu0 %1806 }
 0x3d0   : > { %1850 = vst.msk [vmem:[#allocation2 + $0x3] sm:$0x1] %vm4575_vm10, %v1848_v25 }
 0x3d1   : > { %1812 = vst.msk [vmem:[#allocation2 + $0x2] sm:$0x1] %vm1811_vm4, %v1807_v38 }
 0x3d8   : > { %v1851_v10 = vld [vmem:[#allocation2] sm:$0xf] }
 0x3d9   : > { %v1915_v12 = vrot.slane %v1851_v10, %v1914_v42  ;;  %v1923_v13 = vrot.slane %v1851_v10, %v1922_v44  ;;  %v1911_v15 = vrot.slane %v1851_v10, %v1910_v35  ;;  %v1919_v16 = vrot.slane %v1851_v10, %v1918_v47 }
 0x3db   : > { %1994 = vmatprep.mubr.f32.mxu0 %v1915_v12  ;;  %2322 = vmatprep.mubr.msk.f32.mxu1 %vm1927_vm8, %v1923_v13 }
 0x3dc   : > { %1995 = vmatmul.mubr.f32.vlgmr.msra.gmra.mxu0 %v1911_v15  ;;  %2065 = vmatmul.mubr.f32.vlgmr.msra.gmra.mxu1 %v1919_v16 }
 0x3dd   : > { %2652 = vmatpush3.msra.mxu0 %v2086_v56  ;;  %2683 = vmatprep.mubr.msk.f32.mxu0 %vm4576_vm13, %v2822_v2 }
 0x3de   : > { %2653 = vmatprep.subr.mxu0 %v2822_v2 }
 0x3df   : > { %2654 = vmatpush3.msra.mxu0 %v2085_v58 }
 0x3e0   : > { %2655 = vmatprep.subr.mxu0 %v2822_v2 }
 0x3e1   : > { %2656 = vmatpush3.msra.mxu0 %v2084_v48 }
 0x3e2   : > { %2657 = vmatprep.subr.mxu0 %v2822_v2 }
 0x3e3   : > { %2658 = vmatpush3.msra.mxu0 %v2083_v18 }
 0x3e4   : > { %2659 = vmatprep.subr.mxu0 %v2822_v2 }
 0x3e5   : > { %2660 = vmatpush3.msra.mxu0 %v2082_v57 }
 0x3e6   : > { %2661 = vmatprep.subr.mxu0 %v2822_v2 }
 0x3e7   : > { %2662 = vmatpush3.msra.mxu0 %v2081_v19 }
 0x3e8   : > { %2663 = vmatprep.subr.mxu0 %v2822_v2 }
 0x3e9   : > { %2664 = vmatpush3.msra.mxu0 %v2080_v21 }
 0x3ea   : > { %2665 = vmatprep.subr.mxu0 %v2822_v2 }
 0x3eb   : > { %2666 = vmatpush3.msra.mxu0 %v2079_v22 }
 0x3ec   : > { %2667 = vmatprep.subr.mxu0 %v2822_v2 }
 0x3ed   : > { %2668 = vmatpush3.msra.mxu0 %v2078_v7 }
 0x3ee   : > { %2669 = vmatprep.subr.mxu0 %v2822_v2 }
 0x3ef   : > { %2670 = vmatpush3.msra.mxu0 %v2077_v9 }
 0x3f0   : > { %2671 = vmatprep.subr.mxu0 %v2822_v2 }
 0x3f1   : > { %2672 = vmatpush3.msra.mxu0 %v2076_v24 }
 0x3f2   : > { %2673 = vmatprep.subr.mxu0 %v2822_v2 }
 0x3f3   : > { %2674 = vmatpush3.msra.mxu0 %v2075_v28 }
 0x3f4   : > { %2675 = vmatprep.subr.mxu0 %v2822_v2 }
 0x3f5   : > { %2676 = vmatpush3.msra.mxu0 %v2074_v31 }
 0x3f6   : > { %2677 = vmatprep.subr.mxu0 %v2822_v2 }
 0x3f7   : > { %2678 = vmatpush3.msra.mxu0 %v2073_v34 }
 0x3f8   : > { %2679 = vmatprep.subr.mxu0 %v2822_v2 }
 0x3f9   : > { %2680 = vmatpush3.msra.mxu0 %v2072_v36 }
 0x3fa   : > { %2681 = vmatprep.subr.mxu0 %v2822_v2  ;;  %v2087_v2 = vld [vmem:[%s4476_s7] sm:$0x1] }
 0x3fb   : > { %2682 = vmatpush3.msra.mxu0 %v2071_v37 }
 0x49c   : > { %v2538_v39 = vpop.f32.mrf.mxu0  ;;  %v2066_v40 = vpop.f32.mrf.mxu1 }
 0x49e   : > { %v2539_v45 = vpop.f32.mrf.mxu0  ;;  %v2068_v46 = vpop.f32.mrf.mxu1 }
 0x49f   : > { %v2540_v49 = vadd.f32 %v2539_v45, %v2538_v39 }
 0x4a1   : > { %v1997_v51 = vadd.f32 %v2540_v49, %v1906_v43 }
 0x4a3   : > { %v2067_v55 = vadd.f32 %v2066_v40, %v1997_v51 }
 0x4a5   : > { %v2070_v59 = vmax.f32 %v2067_v55, 0.0 }
 0x4a7   : > { %2684 = vmatmul.mubr.f32.vlgmr.msra.gmra.mxu0 %v2070_v59 }
 0x567   : > { %v2154_v60 = vpop.f32.mrf.mxu0 }
 0x568   : > { %v2155_v0 = vadd.f32 %v2154_v60, %v2087_v2 }
 0x569   : > { %v2685_v62 = vpop.f32.mrf.mxu0 }
 0x56a   : > { %2159 = vst.msk [vmem:[%s297_s20] sm:$0x1] %vm2158_vm0, %v2155_v0 }
 0x56b   : > { %2773 = shalt.err (!%p2770_p3)
}
 0x56c   : > { %s2774_s12 = scalar_lea.hbm %s4434_s13, 16  ;;  %s2778_s19 = scalar_lea.hbm %s4477_s8, 32 }
 0x56d   : > { %p2775_p4 = scmp.ne.s32.totalorder %s4434_s13, %s2774_s12  ;;  %p2779_p9 = scmp.lt.s32.totalorder %s4434_s13, %s4477_s8 }
 0x56e   : > { %p2780_p10 = scmp.lt.s32.totalorder %s2778_s19, %s2774_s12 }
 0x56f   : > { %p2776_p7 = pnand %p2775_p4, %p2940_p5 }
 0x570   : > { %p2781_p11 = por %p2780_p10, %p2779_p9 }
 0x571   : > { %p2777_p8 = pneg %p2776_p7 }
 0x573   : > { %p2782_p12 = pnand %p2781_p11, %p2777_p8 }
 0x575   : > { %2785 = shalt.err (!%p2782_p12)
}
 0x576   : > { %2687 = dma.vmem_to_hbm [thread:$0]  (%p2940_p5), %s2174_s21, 16, %s4434_s13, %s2161_s24  }
 0x577 PF: > { %p2693_p13 = scmp.ge.s32.totalorder %s2820_s30, 2  ;;  %s2185_s23 = sand.u32 1, %s2808_s27  }
 0x578   : > { %s2186_s25 = scalar_lea.sflag [#allocation4], %s2185_s23 }
 0x579   : > { %p2690_p0 = pnand %p2693_p13, %p2944_p6 }
 0x57b   : > { %p2691_p1 = pneg %p2690_p0 }
 0x57d   : > { %2803 = dma.done.wait (%p2691_p1), %s2186_s25, 16  }
 0x57e   : > { %2805 = vsyncadd (%p2691_p1), %s2186_s25, 4294967280  ;;  %p18_p2 = scmp.ge.s32.totalorder %s2927_s11, 4   ;;  %s4577_s27 = smov %s2812_s28 }
 0x57f   : > { %s4578_s28 = smov %s2816_s29  ;;  %s4579_s29 = smov %s2938_s14 }
 0x580   : > { %s4580_s30 = smov %s2927_s11  ;;  %20 = sbr.rel (!%p18_p2) target bundleno = 3 (0x3), region = 91 }
 0x585   :  { %2190 = vsyncpa [#allocation4], 1 }
 0x586   :  { %2192 = vsyncpa [#allocation4 + $0x1], 1 }

</bundles_post_ra>
